<compile_context>
chip_gen: v7x
topology: tpu7x:2x2x1
jax: 0.10.0
libtpu: 0.0.40
codegen_flags: <defaults>
</compile_context>

<pallas_src>
import jax
import jax.numpy as jnp
from jax.experimental import pallas as pl
from jax.experimental.pallas import tpu as pltpu


def fcml_kernel(x_ref, w1_ref, b1_ref, w2_ref, b2_ref, out_ref):
    # fc1: (TB, F) @ (F, F) + (1, F), f32 accumulation on the MXU.
    h = jnp.dot(x_ref[...], w1_ref[...], preferred_element_type=jnp.float32)
    h = h + b1_ref[...]
    # Stable sigmoid: sigmoid(z) = 0.5 * (tanh(z/2) + 1)   (EUP path).
    h = 0.5 * (jnp.tanh(0.5 * h) + 1.0)
    # fc2: (TB, F) @ (F, F) + (1, F), f32 accumulation.
    y = jnp.dot(h.astype(w2_ref.dtype), w2_ref[...],
                preferred_element_type=jnp.float32)
    out_ref[...] = (y + b2_ref[...]).astype(out_ref.dtype)


def _pick_batch_tile(B, cap=256):
    """Largest legal batch tile: full batch if small, else a multiple-of-8
    divisor of B no larger than `cap` (falls back to a single full tile)."""
    if B <= cap:
        return B
    tb = (cap // 8) * 8
    while tb >= 8:
        if B % tb == 0:
            return tb
        tb -= 8
    return B  # single tile; block dim == array dim is always legal


def fcml_forward(x, w1, b1, w2, b2, *, tb=None):
    B, F = x.shape
    assert w1.shape == (F, F) and w2.shape == (F, F)
    assert b1.size == F and b2.size == F
    assert F % 128 == 0, "feature dim must be lane (128) aligned"

    if tb is None:
        tb = _pick_batch_tile(B)
    assert B % tb == 0, "batch tile must divide B"
    assert tb % 8 == 0 or tb == B, "batch tile must be 8-aligned (or == B)"

    # Biases are tiny; keep them f32 for the accumulate-and-add.
    b1f = jnp.reshape(b1, (1, F)).astype(jnp.float32)
    b2f = jnp.reshape(b2, (1, F)).astype(jnp.float32)

    out_dtype = x.dtype
    wbytes = w1.dtype.itemsize
    xbytes = x.dtype.itemsize

    cost = pl.CostEstimate(
        flops=2 * 2 * B * F * F,                      # two (B,F)x(F,F) matmuls
        transcendentals=B * F,                        # sigmoid
        bytes_accessed=(2 * F * F * wbytes            # weights (resident, 1x)
                        + B * F * xbytes              # x
                        + B * F * jnp.dtype(out_dtype).itemsize  # out
                        + 2 * F * 4),                 # biases
    )

    return pl.pallas_call(
        fcml_kernel,
        out_shape=jax.ShapeDtypeStruct((B, F), out_dtype),
        grid=(B // tb,),                              # 1-D grid over batch only
        in_specs=[
            pl.BlockSpec((tb, F), lambda b: (b, 0)),  # x tile
            pl.BlockSpec((F, F), lambda b: (0, 0)),   # W1 (resident across grid)
            pl.BlockSpec((1, F), lambda b: (0, 0)),   # b1 (resident)
            pl.BlockSpec((F, F), lambda b: (0, 0)),   # W2 (resident)
            pl.BlockSpec((1, F), lambda b: (0, 0)),   # b2 (resident)
        ],
        out_specs=pl.BlockSpec((tb, F), lambda b: (b, 0)),
        compiler_params=pltpu.CompilerParams(
            dimension_semantics=("parallel",),
        ),
        cost_estimate=cost,
    )(x, w1, b1f, w2, b2f)
    # TODO(synk): if F is scaled up far enough that the full weights no longer
    # fit VMEM, reintroduce a K-tiled reduction axis sized per generation
    # (v7x has only 64 MiB VMEM) and set vmem_limit_bytes explicitly.


def reference_forward(x, w1, b1, w2, b2):
    h = jax.nn.sigmoid(x @ w1 + b1[None, :])
    return h @ w2 + b2[None, :]


if __name__ == "__main__":
    numBits = 512   # module default (fc1/fc2 are numBits x numBits)
    batch = 16      # small batch; single 8-aligned tile -> grid of 1 step

    key = jax.random.PRNGKey(0)
    kx, kw1, kb1, kw2, kb2 = jax.random.split(key, 5)

    # Deterministic synthetic parameters (PyTorch Linear-style uniform bound).
    bound = 1.0 / jnp.sqrt(numBits)
    x = jax.random.normal(kx, (batch, numBits), dtype=jnp.float32)
    w1 = jax.random.uniform(kw1, (numBits, numBits), jnp.float32, -bound, bound)
    b1 = jax.random.uniform(kb1, (numBits,), jnp.float32, -bound, bound)
    w2 = jax.random.uniform(kw2, (numBits, numBits), jnp.float32, -bound, bound)
    b2 = jax.random.uniform(kb2, (numBits,), jnp.float32, -bound, bound)

    out = fcml_forward(x, w1, b1, w2, b2)
    out = jax.block_until_ready(out)

    ref = reference_forward(x, w1, b1, w2, b2)
    assert out.shape == (batch, numBits)
    assert jnp.allclose(out, ref, atol=1e-2, rtol=1e-2), "mismatch vs reference"

    print("KERNEL_OK")
</pallas_src>

<mosaic_0001>
module attributes {stable_mosaic.version = 11 : i64} {
  func.func @fcml_kernel(%arg0: i32, %arg1: memref<16x512xf32, #tpu.memory_space<vmem>>, %arg2: memref<512x512xf32, #tpu.memory_space<vmem>>, %arg3: memref<1x512xf32, #tpu.memory_space<vmem>>, %arg4: memref<512x512xf32, #tpu.memory_space<vmem>>, %arg5: memref<1x512xf32, #tpu.memory_space<vmem>>, %arg6: memref<16x512xf32, #tpu.memory_space<vmem>>) attributes {dimension_semantics = [#tpu.dimension_semantics<parallel>], iteration_bounds = array<i64: 1>, scalar_prefetch = 0 : i64, scratch_operands = 0 : i64, tpu.core_type = #tpu.core_type<tc>, window_params = [{transform_indices = @transform_0, window_bounds = array<i64: 16, 512>}, {pipeline_mode = #tpu.pipeline_mode<synchronous>, transform_indices = @transform_1, window_bounds = array<i64: 512, 512>}, {pipeline_mode = #tpu.pipeline_mode<synchronous>, transform_indices = @transform_2, window_bounds = array<i64: 1, 512>}, {pipeline_mode = #tpu.pipeline_mode<synchronous>, transform_indices = @transform_3, window_bounds = array<i64: 512, 512>}, {pipeline_mode = #tpu.pipeline_mode<synchronous>, transform_indices = @transform_4, window_bounds = array<i64: 1, 512>}, {transform_indices = @transform_5, window_bounds = array<i64: 16, 512>}]} {
    %c0 = arith.constant 0 : index
    %c0_0 = arith.constant 0 : index
    %0 = vector.load %arg1[%c0, %c0_0] : memref<16x512xf32, #tpu.memory_space<vmem>>, vector<16x512xf32>
    %c0_1 = arith.constant 0 : index
    %c0_2 = arith.constant 0 : index
    %1 = vector.load %arg2[%c0_1, %c0_2] : memref<512x512xf32, #tpu.memory_space<vmem>>, vector<512x512xf32>
    %cst = arith.constant dense<0.000000e+00> : vector<16x512xf32>
    %2 = tpu.matmul %0, %1, %cst {dimension_numbers = #tpu.dot_dimension_numbers<[1], [0], [0], [1], [0, 0, 1, 1], [], []>} : vector<16x512xf32>, vector<512x512xf32>, vector<16x512xf32> -> vector<16x512xf32>
    %c0_3 = arith.constant 0 : index
    %c0_4 = arith.constant 0 : index
    %3 = vector.load %arg3[%c0_3, %c0_4] : memref<1x512xf32, #tpu.memory_space<vmem>>, vector<1x512xf32>
    %4 = vector.broadcast %3 : vector<1x512xf32> to vector<16x512xf32>
    %5 = arith.addf %2, %4 : vector<16x512xf32>
    %cst_5 = arith.constant 5.000000e-01 : f32
    %6 = vector.broadcast %cst_5 : f32 to vector<16x512xf32>
    %7 = arith.mulf %6, %5 : vector<16x512xf32>
    %8 = math.tanh %7 : vector<16x512xf32>
    %cst_6 = arith.constant 1.000000e+00 : f32
    %9 = vector.broadcast %cst_6 : f32 to vector<16x512xf32>
    %10 = arith.addf %8, %9 : vector<16x512xf32>
    %cst_7 = arith.constant 5.000000e-01 : f32
    %11 = vector.broadcast %cst_7 : f32 to vector<16x512xf32>
    %12 = arith.mulf %11, %10 : vector<16x512xf32>
    %c0_8 = arith.constant 0 : index
    %c0_9 = arith.constant 0 : index
    %13 = vector.load %arg4[%c0_8, %c0_9] : memref<512x512xf32, #tpu.memory_space<vmem>>, vector<512x512xf32>
    %cst_10 = arith.constant dense<0.000000e+00> : vector<16x512xf32>
    %14 = tpu.matmul %12, %13, %cst_10 {dimension_numbers = #tpu.dot_dimension_numbers<[1], [0], [0], [1], [0, 0, 1, 1], [], []>} : vector<16x512xf32>, vector<512x512xf32>, vector<16x512xf32> -> vector<16x512xf32>
    %c0_11 = arith.constant 0 : index
    %c0_12 = arith.constant 0 : index
    %15 = vector.load %arg5[%c0_11, %c0_12] : memref<1x512xf32, #tpu.memory_space<vmem>>, vector<1x512xf32>
    %16 = vector.broadcast %15 : vector<1x512xf32> to vector<16x512xf32>
    %17 = arith.addf %14, %16 : vector<16x512xf32>
    %c0_13 = arith.constant 0 : index
    %c0_14 = arith.constant 0 : index
    %18 = vector.load %arg6[%c0_13, %c0_14] : memref<16x512xf32, #tpu.memory_space<vmem>>, vector<16x512xf32>
    tpu.vector_store %arg6[%c0_13, %c0_14], %17 {strides = array<i32>} : memref<16x512xf32, #tpu.memory_space<vmem>>, vector<16x512xf32>,
    return
  }
  func.func @transform_0(%arg0: i32) -> (i32, i32) {
    %c0_i32 = arith.constant 0 : i32
    %c0_i32_0 = arith.constant 0 : i32
    return %arg0, %c0_i32 : i32, i32
  }
  func.func @transform_1(%arg0: i32) -> (i32, i32) {
    %c0_i32 = arith.constant 0 : i32
    %c0_i32_0 = arith.constant 0 : i32
    %c0_i32_1 = arith.constant 0 : i32
    return %c0_i32, %c0_i32_0 : i32, i32
  }
  func.func @transform_2(%arg0: i32) -> (i32, i32) {
    %c0_i32 = arith.constant 0 : i32
    %c0_i32_0 = arith.constant 0 : i32
    %c0_i32_1 = arith.constant 0 : i32
    return %c0_i32, %c0_i32_0 : i32, i32
  }
  func.func @transform_3(%arg0: i32) -> (i32, i32) {
    %c0_i32 = arith.constant 0 : i32
    %c0_i32_0 = arith.constant 0 : i32
    %c0_i32_1 = arith.constant 0 : i32
    return %c0_i32, %c0_i32_0 : i32, i32
  }
  func.func @transform_4(%arg0: i32) -> (i32, i32) {
    %c0_i32 = arith.constant 0 : i32
    %c0_i32_0 = arith.constant 0 : i32
    %c0_i32_1 = arith.constant 0 : i32
    return %c0_i32, %c0_i32_0 : i32, i32
  }
  func.func @transform_5(%arg0: i32) -> (i32, i32) {
    %c0_i32 = arith.constant 0 : i32
    %c0_i32_0 = arith.constant 0 : i32
    return %arg0, %c0_i32 : i32, i32
  }
}

</mosaic_0001>

<bundles_post_ra>
// kernel: tpu_custom_call.1
= control target key start
LH: loop header
LB: loop body
LE: loop exit
PB: predicated region body
PF: predicated region fallthrough
CT: control target
= control target key end

     0   :  { %10 = vsyncpa [#allocation3], 0  ;;  %s2110_s0 = inlined_call_operand.hbm [shape: f32[16,512], index: 0, kind: input, shape index: {}]   ;;  %s2111_s1 = inlined_call_operand.hbm [shape: f32[512,512], index: 1, kind: input, shape index: {}]   ;;  %s2112_s2 = inlined_call_operand.vmem [shape: f32[1,512], index: 2, kind: input, shape index: {}]   ;;  %s2113_s3 = inlined_call_operand.hbm [shape: f32[512,512], index: 3, kind: input, shape index: {}]   ;;  %s2114_s4 = inlined_call_operand.vmem [shape: f32[1,512], index: 4, kind: input, shape index: {}]   ;;  %s2115_s5 = inlined_call_operand.hbm [shape: f32[16,512], index: 5, kind: output, shape index: {}]  }
   0x1   :  { %11 = vsyncpa [#allocation6], 0 }
   0x2   :  { %12 = vsyncpa [#allocation4], 0  ;;  %s1960_s18 = smov [#allocation5]   ;;  %s1961_s20 = smov [#allocation2]  }
   0x3   :  { %s30_s19 = sshll.u32 %s1960_s18, 4  ;;  %s18_s21 = sshll.u32 %s1961_s20, 4  ;;  %s31_s19 = int_to_ptr.vmem [resolvable:$true] %s30_s19  ;;  %s1996_s21 = int_to_ptr.vmem [resolvable:$true] %s18_s21 }
   0x4   :  { %s1866_s24 = scalar_lea.hbm %s2111_s1, 32768 }
   0x5   :  { %p1867_p0 = scmp.ne.s32.totalorder %s2111_s1, %s1866_s24  ;;  %p1870_p1 = scmp.lt.u32.totalorder %s1866_s24, %s2111_s1 }
   0x7   :  { %p1872_p2 = pnand %p1870_p1, %p1867_p0 }
   0x9   :  { %1875 = shalt.err (!%p1872_p2)
}
   0xa   :  { %s1876_s29 = scalar_lea.vmem %s31_s19, 32768  ;;  %p1881_p4 = scmp.lt.s32.totalorder %s31_s19, %s31_s19 }
   0xb   :  { %p1877_p3 = scmp.ne.s32.totalorder %s31_s19, %s1876_s29  ;;  %p1882_p5 = scmp.lt.s32.totalorder %s1876_s29, %s1876_s29 }
   0xd   :  { %p1883_p6 = por %p1882_p5, %p1881_p4 }
   0xf   :  { %p1884_p7 = pnand %p1883_p6, %p1877_p3 }
  0x11   :  { %1887 = shalt.err (!%p1884_p7)
}
  0x12   :  { %s1962_s30 = smov 512   ;;  %s1963_s6 = smov 32  }
  0x13   :  { %36 = dma.hbm_to_vmem [thread:$0]  %s2111_s1, 32768, %s31_s19, [#allocation6], %s1962_s30, %s1962_s30, %s1963_s6  }
  0x14   :  { %s1888_s11 = scalar_lea.hbm %s2110_s0, 1024 }
  0x15   :  { %p1889_p8 = scmp.ne.s32.totalorder %s2110_s0, %s1888_s11  ;;  %p1892_p9 = scmp.lt.u32.totalorder %s1888_s11, %s2110_s0 }
  0x17   :  { %p1894_p10 = pnand %p1892_p9, %p1889_p8 }
  0x19   :  { %1897 = shalt.err (!%p1894_p10)
}
  0x1a   :  { %s1898_s16 = scalar_lea.vmem %s1996_s21, 1024  ;;  %p1903_p12 = scmp.lt.s32.totalorder %s1996_s21, %s1996_s21 }
  0x1b   :  { %p1899_p11 = scmp.ne.s32.totalorder %s1996_s21, %s1898_s16  ;;  %p1904_p13 = scmp.lt.s32.totalorder %s1898_s16, %s1898_s16 }
  0x1d   :  { %p1905_p0 = por %p1904_p13, %p1903_p12 }
  0x1f   :  { %p1906_p1 = pnand %p1905_p0, %p1899_p11 }
  0x21   :  { %1909 = shalt.err (!%p1906_p1)
}
  0x22   :  { %24 = dma.hbm_to_vmem [thread:$0]  %s2110_s0, 1024, %s1996_s21, [#allocation3], %s1962_s30, %s1962_s30, %s1963_s6  }
  0x23   :  { %s1964_s18 = smov [#allocation7]   ;;  %s1910_s23 = scalar_lea.hbm %s2113_s3, 32768 }
  0x24   :  { %s44_s19 = sshll.u32 %s1964_s18, 4  ;;  %p1911_p2 = scmp.ne.s32.totalorder %s2113_s3, %s1910_s23  ;;  %s45_s19 = int_to_ptr.vmem [resolvable:$true] %s44_s19 }
  0x25   :  { %p1914_p3 = scmp.lt.u32.totalorder %s1910_s23, %s2113_s3 }
  0x27   :  { %p1916_p4 = pnand %p1914_p3, %p1911_p2 }
  0x29   :  { %1919 = shalt.err (!%p1916_p4)
}
  0x2a   :  { %s1920_s28 = scalar_lea.vmem %s45_s19, 32768  ;;  %p1925_p6 = scmp.lt.s32.totalorder %s45_s19, %s45_s19 }
  0x2b   :  { %p1921_p5 = scmp.ne.s32.totalorder %s45_s19, %s1920_s28  ;;  %p1926_p7 = scmp.lt.s32.totalorder %s1920_s28, %s1920_s28 }
  0x2d   :  { %p1927_p8 = por %p1926_p7, %p1925_p6 }
  0x2f   :  { %p1928_p9 = pnand %p1927_p8, %p1921_p5 }
  0x31   :  { %1931 = shalt.err (!%p1928_p9)
}
  0x32   :  { %50 = dma.hbm_to_vmem [thread:$0]  %s2113_s3, 32768, %s45_s19, [#allocation6], %s1962_s30, %s1962_s30, %s1963_s6  }
  0x33   :  { %1954 = dma.done.wait [#allocation3], 1024  }
  0x34   :  { %1955 = vsyncadd [#allocation3], 4294966272 }
  0x35   :  { %1956 = dma.done.wait [#allocation6], 65536  }
  0x36   :  { %1957 = vsyncadd [#allocation6], 4294901760  ;;  %v71_v0 = vld [vmem:[#allocation5 + $0x8] sm:$0xff]  ;;  %v73_v2 = vld [vmem:[#allocation5 + $0x18] sm:$0xff] }
  0x37   :  { %v75_v1 = vld [vmem:[#allocation5 + $0x28] sm:$0xff]  ;;  %v77_v4 = vld [vmem:[#allocation5 + $0x38] sm:$0xff]  ;;  %v70_v5 = vld [vmem:[#allocation5] sm:$0xff] }
  0x38   :  { %v1300_v3 = vpack.c.bf16 %v75_v1, %v71_v0  ;;  %v74_v6 = vld [vmem:[#allocation5 + $0x20] sm:$0xff]  ;;  %v1428_v7 = vpack.c.bf16 %v77_v4, %v73_v2  ;;  %v72_v9 = vld [vmem:[#allocation5 + $0x10] sm:$0xff]  ;;  %v79_v11 = vld [vmem:[#allocation5 + $0x48] sm:$0xff] }
  0x39   :  { %v1302_v8 = vpack.c.bf16 %v74_v6, %v70_v5  ;;  %v76_v10 = vld [vmem:[#allocation5 + $0x30] sm:$0xff]  ;;  %v83_v13 = vld [vmem:[#allocation5 + $0x68] sm:$0xff]  ;;  %v81_v14 = vld [vmem:[#allocation5 + $0x58] sm:$0xff] }
  0x3a   :  { %1301 = vmatprep.subr.bf16.mxu0 %v1300_v3  ;;  %v1430_v12 = vpack.c.bf16 %v76_v10, %v72_v9  ;;  %v85_v15 = vld [vmem:[#allocation5 + $0x78] sm:$0xff]  ;;  %1429 = vmatprep.subr.bf16.mxu1 %v1428_v7  ;;  %v1304_v16 = vpack.c.bf16 %v83_v13, %v79_v11  ;;  %v78_v18 = vld [vmem:[#allocation5 + $0x40] sm:$0xff]  ;;  %v80_v20 = vld [vmem:[#allocation5 + $0x50] sm:$0xff] }
  0x3b   :  { %1303 = vmatpush1.bf16.msra.mxu0 %v1302_v8  ;;  %v1432_v17 = vpack.c.bf16 %v85_v15, %v81_v14  ;;  %v82_v19 = vld [vmem:[#allocation5 + $0x60] sm:$0xff]  ;;  %v84_v22 = vld [vmem:[#allocation5 + $0x70] sm:$0xff]  ;;  %v87_v23 = vld [vmem:[#allocation5 + $0x88] sm:$0xff] }
  0x3c   :  { %1431 = vmatpush1.bf16.msra.mxu1 %v1430_v12  ;;  %v1306_v21 = vpack.c.bf16 %v82_v19, %v78_v18  ;;  %v91_v24 = vld [vmem:[#allocation5 + $0xa8] sm:$0xff]  ;;  %1305 = vmatprep.subr.bf16.mxu0 %v1304_v16  ;;  %v1434_v25 = vpack.c.bf16 %v84_v22, %v80_v20  ;;  %v89_v27 = vld [vmem:[#allocation5 + $0x98] sm:$0xff]  ;;  %v86_v29 = vld [vmem:[#allocation5 + $0x80] sm:$0xff] }
  0x3d   :  { %1433 = vmatprep.subr.bf16.mxu1 %v1432_v17  ;;  %v1308_v26 = vpack.c.bf16 %v91_v24, %v87_v23  ;;  %v93_v28 = vld [vmem:[#allocation5 + $0xb8] sm:$0xff]  ;;  %v90_v31 = vld [vmem:[#allocation5 + $0xa0] sm:$0xff]  ;;  %v88_v32 = vld [vmem:[#allocation5 + $0x90] sm:$0xff] }
  0x3e   :  { %v1436_v30 = vpack.c.bf16 %v93_v28, %v89_v27  ;;  %v92_v33 = vld [vmem:[#allocation5 + $0xb0] sm:$0xff]  ;;  %v1310_v34 = vpack.c.bf16 %v90_v31, %v86_v29  ;;  %v95_v35 = vld [vmem:[#allocation5 + $0xc8] sm:$0xff]  ;;  %v97_v37 = vld [vmem:[#allocation5 + $0xd8] sm:$0xff] }
  0x3f   :  { %1307 = vmatpush1.bf16.msra.mxu0 %v1306_v21  ;;  %v99_v36 = vld [vmem:[#allocation5 + $0xe8] sm:$0xff]  ;;  %v1438_v38 = vpack.c.bf16 %v92_v33, %v88_v32  ;;  %v101_v40 = vld [vmem:[#allocation5 + $0xf8] sm:$0xff]  ;;  %v94_v41 = vld [vmem:[#allocation5 + $0xc0] sm:$0xff] }
  0x40   :  { %1435 = vmatpush1.bf16.msra.mxu1 %v1434_v25  ;;  %1309 = vmatprep.subr.bf16.mxu0 %v1308_v26  ;;  %v1312_v39 = vpack.c.bf16 %v99_v36, %v95_v35  ;;  %v98_v42 = vld [vmem:[#allocation5 + $0xe0] sm:$0xff]  ;;  %v1440_v43 = vpack.c.bf16 %v101_v40, %v97_v37  ;;  %v96_v44 = vld [vmem:[#allocation5 + $0xd0] sm:$0xff]  ;;  %v103_v46 = vld [vmem:[#allocation5 + $0x108] sm:$0xff] }
  0x41   :  { %1437 = vmatprep.subr.bf16.mxu1 %v1436_v30  ;;  %v100_v45 = vld [vmem:[#allocation5 + $0xf0] sm:$0xff]  ;;  %v107_v47 = vld [vmem:[#allocation5 + $0x128] sm:$0xff]  ;;  %v105_v48 = vld [vmem:[#allocation5 + $0x118] sm:$0xff]  ;;  %v1314_v50 = vpack.c.bf16 %v98_v42, %v94_v41 }
  0x42   :  { %v109_v49 = vld [vmem:[#allocation5 + $0x138] sm:$0xff]  ;;  %v1442_v51 = vpack.c.bf16 %v100_v45, %v96_v44  ;;  %v1316_v52 = vpack.c.bf16 %v107_v47, %v103_v46  ;;  %v102_v53 = vld [vmem:[#allocation5 + $0x100] sm:$0xff]  ;;  %v104_v55 = vld [vmem:[#allocation5 + $0x110] sm:$0xff] }
  0x43   :  { %1311 = vmatpush1.bf16.msra.mxu0 %v1310_v34  ;;  %v106_v54 = vld [vmem:[#allocation5 + $0x120] sm:$0xff]  ;;  %v1444_v56 = vpack.c.bf16 %v109_v49, %v105_v48  ;;  %v108_v57 = vld [vmem:[#allocation5 + $0x130] sm:$0xff]  ;;  %v111_v58 = vld [vmem:[#allocation5 + $0x148] sm:$0xff] }
  0x44   :  { %1439 = vmatpush1.bf16.msra.mxu1 %v1438_v38  ;;  %1313 = vmatprep.subr.bf16.mxu0 %v1312_v39  ;;  %v115_v59 = vld [vmem:[#allocation5 + $0x168] sm:$0xff]  ;;  %v113_v60 = vld [vmem:[#allocation5 + $0x158] sm:$0xff]  ;;  %v1318_v62 = vpack.c.bf16 %v106_v54, %v102_v53  ;;  %v1446_v63 = vpack.c.bf16 %v108_v57, %v104_v55  ;;  %v110_v1 = vld [vmem:[#allocation5 + $0x140] sm:$0xff] }
  0x45   :  { %1441 = vmatprep.subr.bf16.mxu1 %v1440_v43  ;;  %v117_v61 = vld [vmem:[#allocation5 + $0x178] sm:$0xff]  ;;  %v1320_v0 = vpack.c.bf16 %v115_v59, %v111_v58  ;;  %v114_v2 = vld [vmem:[#allocation5 + $0x160] sm:$0xff]  ;;  %v112_v3 = vld [vmem:[#allocation5 + $0x150] sm:$0xff] }
  0x46   :  { %v1448_v4 = vpack.c.bf16 %v117_v61, %v113_v60  ;;  %v116_v5 = vld [vmem:[#allocation5 + $0x170] sm:$0xff]  ;;  %v119_v6 = vld [vmem:[#allocation5 + $0x188] sm:$0xff]  ;;  %v121_v8 = vld [vmem:[#allocation5 + $0x198] sm:$0xff]  ;;  %v1322_v10 = vpack.c.bf16 %v114_v2, %v110_v1 }
  0x47   :  { %1315 = vmatpush1.bf16.msra.mxu0 %v1314_v50  ;;  %v123_v7 = vld [vmem:[#allocation5 + $0x1a8] sm:$0xff]  ;;  %v125_v9 = vld [vmem:[#allocation5 + $0x1b8] sm:$0xff]  ;;  %v1450_v11 = vpack.c.bf16 %v116_v5, %v112_v3  ;;  %v118_v13 = vld [vmem:[#allocation5 + $0x180] sm:$0xff] }
  0x48   :  { %1443 = vmatpush1.bf16.msra.mxu1 %v1442_v51  ;;  %1317 = vmatprep.subr.bf16.mxu0 %v1316_v52  ;;  %v1324_v12 = vpack.c.bf16 %v123_v7, %v119_v6  ;;  %v122_v14 = vld [vmem:[#allocation5 + $0x1a0] sm:$0xff]  ;;  %v120_v15 = vld [vmem:[#allocation5 + $0x190] sm:$0xff]  ;;  %v1452_v16 = vpack.c.bf16 %v125_v9, %v121_v8  ;;  %v127_v18 = vld [vmem:[#allocation5 + $0x1c8] sm:$0xff] }
  0x49   :  { %1445 = vmatprep.subr.bf16.mxu1 %v1444_v56  ;;  %v124_v17 = vld [vmem:[#allocation5 + $0x1b0] sm:$0xff]  ;;  %v131_v19 = vld [vmem:[#allocation5 + $0x1e8] sm:$0xff]  ;;  %v129_v20 = vld [vmem:[#allocation5 + $0x1d8] sm:$0xff]  ;;  %v1326_v22 = vpack.c.bf16 %v122_v14, %v118_v13 }
  0x4a   :  { %v133_v21 = vld [vmem:[#allocation5 + $0x1f8] sm:$0xff]  ;;  %v1454_v23 = vpack.c.bf16 %v124_v17, %v120_v15  ;;  %v1328_v24 = vpack.c.bf16 %v131_v19, %v127_v18  ;;  %v126_v25 = vld [vmem:[#allocation5 + $0x1c0] sm:$0xff]  ;;  %v128_v27 = vld [vmem:[#allocation5 + $0x1d0] sm:$0xff] }
  0x4b   :  { %1319 = vmatpush1.bf16.msra.mxu0 %v1318_v62  ;;  %v130_v26 = vld [vmem:[#allocation5 + $0x1e0] sm:$0xff]  ;;  %v1456_v28 = vpack.c.bf16 %v133_v21, %v129_v20  ;;  %v132_v29 = vld [vmem:[#allocation5 + $0x1f0] sm:$0xff]  ;;  %v135_v30 = vld [vmem:[#allocation5 + $0x208] sm:$0xff] }
  0x4c   :  { %1447 = vmatpush1.bf16.msra.mxu1 %v1446_v63  ;;  %1321 = vmatprep.subr.bf16.mxu0 %v1320_v0  ;;  %v139_v31 = vld [vmem:[#allocation5 + $0x228] sm:$0xff]  ;;  %v137_v32 = vld [vmem:[#allocation5 + $0x218] sm:$0xff]  ;;  %v1330_v34 = vpack.c.bf16 %v130_v26, %v126_v25  ;;  %v1458_v35 = vpack.c.bf16 %v132_v29, %v128_v27  ;;  %v134_v37 = vld [vmem:[#allocation5 + $0x200] sm:$0xff] }
  0x4d   :  { %1449 = vmatprep.subr.bf16.mxu1 %v1448_v4  ;;  %v141_v33 = vld [vmem:[#allocation5 + $0x238] sm:$0xff]  ;;  %v1332_v36 = vpack.c.bf16 %v139_v31, %v135_v30  ;;  %v138_v38 = vld [vmem:[#allocation5 + $0x220] sm:$0xff]  ;;  %v136_v39 = vld [vmem:[#allocation5 + $0x210] sm:$0xff] }
  0x4e   :  { %v1460_v40 = vpack.c.bf16 %v141_v33, %v137_v32  ;;  %v140_v41 = vld [vmem:[#allocation5 + $0x230] sm:$0xff]  ;;  %v143_v42 = vld [vmem:[#allocation5 + $0x248] sm:$0xff]  ;;  %v145_v44 = vld [vmem:[#allocation5 + $0x258] sm:$0xff]  ;;  %v1334_v46 = vpack.c.bf16 %v138_v38, %v134_v37 }
  0x4f   :  { %1323 = vmatpush1.bf16.msra.mxu0 %v1322_v10  ;;  %v147_v43 = vld [vmem:[#allocation5 + $0x268] sm:$0xff]  ;;  %v149_v45 = vld [vmem:[#allocation5 + $0x278] sm:$0xff]  ;;  %v1462_v47 = vpack.c.bf16 %v140_v41, %v136_v39  ;;  %v142_v49 = vld [vmem:[#allocation5 + $0x240] sm:$0xff] }
  0x50   :  { %1451 = vmatpush1.bf16.msra.mxu1 %v1450_v11  ;;  %1325 = vmatprep.subr.bf16.mxu0 %v1324_v12  ;;  %v1336_v48 = vpack.c.bf16 %v147_v43, %v143_v42  ;;  %v146_v50 = vld [vmem:[#allocation5 + $0x260] sm:$0xff]  ;;  %v144_v51 = vld [vmem:[#allocation5 + $0x250] sm:$0xff]  ;;  %v1464_v52 = vpack.c.bf16 %v149_v45, %v145_v44  ;;  %v151_v54 = vld [vmem:[#allocation5 + $0x288] sm:$0xff] }
  0x51   :  { %1453 = vmatprep.subr.bf16.mxu1 %v1452_v16  ;;  %v148_v53 = vld [vmem:[#allocation5 + $0x270] sm:$0xff]  ;;  %v155_v55 = vld [vmem:[#allocation5 + $0x2a8] sm:$0xff]  ;;  %v153_v56 = vld [vmem:[#allocation5 + $0x298] sm:$0xff]  ;;  %v1338_v58 = vpack.c.bf16 %v146_v50, %v142_v49 }
  0x52   :  { %v157_v57 = vld [vmem:[#allocation5 + $0x2b8] sm:$0xff]  ;;  %v1466_v59 = vpack.c.bf16 %v148_v53, %v144_v51  ;;  %v1340_v60 = vpack.c.bf16 %v155_v55, %v151_v54  ;;  %v150_v61 = vld [vmem:[#allocation5 + $0x280] sm:$0xff]  ;;  %v152_v63 = vld [vmem:[#allocation5 + $0x290] sm:$0xff] }
  0x53   :  { %1327 = vmatpush1.bf16.msra.mxu0 %v1326_v22  ;;  %v154_v62 = vld [vmem:[#allocation5 + $0x2a0] sm:$0xff]  ;;  %v1468_v0 = vpack.c.bf16 %v157_v57, %v153_v56  ;;  %v156_v1 = vld [vmem:[#allocation5 + $0x2b0] sm:$0xff]  ;;  %v159_v2 = vld [vmem:[#allocation5 + $0x2c8] sm:$0xff] }
  0x54   :  { %1455 = vmatpush1.bf16.msra.mxu1 %v1454_v23  ;;  %1329 = vmatprep.subr.bf16.mxu0 %v1328_v24  ;;  %v163_v3 = vld [vmem:[#allocation5 + $0x2e8] sm:$0xff]  ;;  %v161_v4 = vld [vmem:[#allocation5 + $0x2d8] sm:$0xff]  ;;  %v1342_v6 = vpack.c.bf16 %v154_v62, %v150_v61  ;;  %v158_v7 = vld [vmem:[#allocation5 + $0x2c0] sm:$0xff]  ;;  %v1470_v8 = vpack.c.bf16 %v156_v1, %v152_v63 }
  0x55   :  { %1457 = vmatprep.subr.bf16.mxu1 %v1456_v28  ;;  %v165_v5 = vld [vmem:[#allocation5 + $0x2f8] sm:$0xff]  ;;  %v1344_v9 = vpack.c.bf16 %v163_v3, %v159_v2  ;;  %v162_v10 = vld [vmem:[#allocation5 + $0x2e0] sm:$0xff]  ;;  %v160_v11 = vld [vmem:[#allocation5 + $0x2d0] sm:$0xff] }
  0x56   :  { %v164_v12 = vld [vmem:[#allocation5 + $0x2f0] sm:$0xff]  ;;  %v1472_v13 = vpack.c.bf16 %v165_v5, %v161_v4  ;;  %v167_v14 = vld [vmem:[#allocation5 + $0x308] sm:$0xff]  ;;  %v169_v17 = vld [vmem:[#allocation5 + $0x318] sm:$0xff]  ;;  %v1346_v19 = vpack.c.bf16 %v162_v10, %v158_v7 }
  0x57   :  { %1331 = vmatpush1.bf16.msra.mxu0 %v1330_v34  ;;  %v171_v15 = vld [vmem:[#allocation5 + $0x328] sm:$0xff]  ;;  %v173_v18 = vld [vmem:[#allocation5 + $0x338] sm:$0xff]  ;;  %v1474_v20 = vpack.c.bf16 %v164_v12, %v160_v11  ;;  %v166_v22 = vld [vmem:[#allocation5 + $0x300] sm:$0xff] }
  0x58   :  { %1459 = vmatpush1.bf16.msra.mxu1 %v1458_v35  ;;  %1333 = vmatprep.subr.bf16.mxu0 %v1332_v36  ;;  %v63_v16 = vld [vmem:[#allocation2 + $0x8] sm:$0xff]  ;;  %v1348_v21 = vpack.c.bf16 %v171_v15, %v167_v14  ;;  %v170_v23 = vld [vmem:[#allocation5 + $0x320] sm:$0xff]  ;;  %v168_v24 = vld [vmem:[#allocation5 + $0x310] sm:$0xff]  ;;  %v1476_v25 = vpack.c.bf16 %v173_v18, %v169_v17 }
  0x59   :  { %1461 = vmatprep.subr.bf16.mxu1 %v1460_v40  ;;  %412 = vmatprep.mubr.f32.mxu0 %v63_v16  ;;  %v172_v26 = vld [vmem:[#allocation5 + $0x330] sm:$0xff]  ;;  %v175_v27 = vld [vmem:[#allocation5 + $0x348] sm:$0xff]  ;;  %v177_v29 = vld [vmem:[#allocation5 + $0x358] sm:$0xff]  ;;  %v1350_v31 = vpack.c.bf16 %v170_v23, %v166_v22 }
  0x5a   :  { %566 = vmatprep.mubr.f32.mxu1 %v63_v16  ;;  %v179_v28 = vld [vmem:[#allocation5 + $0x368] sm:$0xff]  ;;  %v181_v30 = vld [vmem:[#allocation5 + $0x378] sm:$0xff]  ;;  %v1478_v32 = vpack.c.bf16 %v172_v26, %v168_v24  ;;  %v174_v34 = vld [vmem:[#allocation5 + $0x340] sm:$0xff] }
  0x5b   :  { %1335 = vmatpush1.bf16.msra.mxu0 %v1334_v46  ;;  %v1352_v33 = vpack.c.bf16 %v179_v28, %v175_v27  ;;  %v178_v35 = vld [vmem:[#allocation5 + $0x360] sm:$0xff]  ;;  %v176_v36 = vld [vmem:[#allocation5 + $0x350] sm:$0xff]  ;;  %v1480_v37 = vpack.c.bf16 %v181_v30, %v177_v29  ;;  %v183_v39 = vld [vmem:[#allocation5 + $0x388] sm:$0xff] }
  0x5c   :  { %1463 = vmatpush1.bf16.msra.mxu1 %v1462_v47  ;;  %1337 = vmatprep.subr.bf16.mxu0 %v1336_v48  ;;  %v180_v38 = vld [vmem:[#allocation5 + $0x370] sm:$0xff]  ;;  %v187_v40 = vld [vmem:[#allocation5 + $0x3a8] sm:$0xff]  ;;  %v185_v41 = vld [vmem:[#allocation5 + $0x398] sm:$0xff]  ;;  %v1354_v43 = vpack.c.bf16 %v178_v35, %v174_v34 }
  0x5d   :  { %1465 = vmatprep.subr.bf16.mxu1 %v1464_v52  ;;  %v189_v42 = vld [vmem:[#allocation5 + $0x3b8] sm:$0xff]  ;;  %v1482_v44 = vpack.c.bf16 %v180_v38, %v176_v36  ;;  %v1356_v45 = vpack.c.bf16 %v187_v40, %v183_v39  ;;  %v182_v46 = vld [vmem:[#allocation5 + $0x380] sm:$0xff]  ;;  %v184_v48 = vld [vmem:[#allocation5 + $0x390] sm:$0xff] }
  0x5e   :  { %v186_v47 = vld [vmem:[#allocation5 + $0x3a0] sm:$0xff]  ;;  %v1484_v49 = vpack.c.bf16 %v189_v42, %v185_v41  ;;  %v188_v50 = vld [vmem:[#allocation5 + $0x3b0] sm:$0xff]  ;;  %v191_v51 = vld [vmem:[#allocation5 + $0x3c8] sm:$0xff] }
  0x5f   :  { %1339 = vmatpush1.bf16.msra.mxu0 %v1338_v58  ;;  %v195_v52 = vld [vmem:[#allocation5 + $0x3e8] sm:$0xff]  ;;  %v193_v53 = vld [vmem:[#allocation5 + $0x3d8] sm:$0xff]  ;;  %v1358_v55 = vpack.c.bf16 %v186_v47, %v182_v46  ;;  %v1486_v56 = vpack.c.bf16 %v188_v50, %v184_v48  ;;  %v190_v58 = vld [vmem:[#allocation5 + $0x3c0] sm:$0xff] }
  0x60   :  { %1467 = vmatpush1.bf16.msra.mxu1 %v1466_v59  ;;  %1341 = vmatprep.subr.bf16.mxu0 %v1340_v60  ;;  %v197_v54 = vld [vmem:[#allocation5 + $0x3f8] sm:$0xff]  ;;  %v1360_v57 = vpack.c.bf16 %v195_v52, %v191_v51  ;;  %v194_v59 = vld [vmem:[#allocation5 + $0x3e0] sm:$0xff]  ;;  %v192_v60 = vld [vmem:[#allocation5 + $0x3d0] sm:$0xff] }
  0x61   :  { %1469 = vmatprep.subr.bf16.mxu1 %v1468_v0  ;;  %v1488_v61 = vpack.c.bf16 %v197_v54, %v193_v53  ;;  %v196_v62 = vld [vmem:[#allocation5 + $0x3f0] sm:$0xff]  ;;  %v199_v63 = vld [vmem:[#allocation5 + $0x408] sm:$0xff]  ;;  %v201_v1 = vld [vmem:[#allocation5 + $0x418] sm:$0xff]  ;;  %v1362_v3 = vpack.c.bf16 %v194_v59, %v190_v58 }
  0x62   :  { %v203_v0 = vld [vmem:[#allocation5 + $0x428] sm:$0xff]  ;;  %v205_v2 = vld [vmem:[#allocation5 + $0x438] sm:$0xff]  ;;  %v1490_v4 = vpack.c.bf16 %v196_v62, %v192_v60  ;;  %v202_v7 = vld [vmem:[#allocation5 + $0x420] sm:$0xff] }
  0x63   :  { %1343 = vmatpush1.bf16.msra.mxu0 %v1342_v6  ;;  %v1364_v5 = vpack.c.bf16 %v203_v0, %v199_v63  ;;  %v198_v6 = vld [vmem:[#allocation5 + $0x400] sm:$0xff]  ;;  %v204_v10 = vld [vmem:[#allocation5 + $0x430] sm:$0xff]  ;;  %v207_v11 = vld [vmem:[#allocation5 + $0x448] sm:$0xff] }
  0x64   :  { %1471 = vmatpush1.bf16.msra.mxu1 %v1470_v8  ;;  %1345 = vmatprep.subr.bf16.mxu0 %v1344_v9  ;;  %v200_v8 = vld [vmem:[#allocation5 + $0x410] sm:$0xff]  ;;  %v1492_v9 = vpack.c.bf16 %v205_v2, %v201_v1  ;;  %v211_v12 = vld [vmem:[#allocation5 + $0x468] sm:$0xff]  ;;  %v213_v14 = vld [vmem:[#allocation5 + $0x478] sm:$0xff]  ;;  %v1366_v16 = vpack.c.bf16 %v202_v7, %v198_v6 }
  0x65   :  { %1473 = vmatprep.subr.bf16.mxu1 %v1472_v13  ;;  %v209_v13 = vld [vmem:[#allocation5 + $0x458] sm:$0xff]  ;;  %v62_v15 = vld [vmem:[#allocation2] sm:$0xff]  ;;  %v1494_v17 = vpack.c.bf16 %v204_v10, %v200_v8  ;;  %v1368_v18 = vpack.c.bf16 %v211_v12, %v207_v11  ;;  %v212_v23 = vld [vmem:[#allocation5 + $0x470] sm:$0xff] }
  0x66   :  { %v1496_v22 = vpack.c.bf16 %v213_v14, %v209_v13  ;;  %v215_v24 = vld [vmem:[#allocation5 + $0x488] sm:$0xff]  ;;  %v217_v26 = vld [vmem:[#allocation5 + $0x498] sm:$0xff]  ;;  %v220_v35 = vld [vmem:[#allocation5 + $0x4b0] sm:$0xff] }
  0x67   :  { %1347 = vmatpush1.bf16.msra.mxu0 %v1346_v19  ;;  %v206_v19 = vld [vmem:[#allocation5 + $0x440] sm:$0xff]  ;;  %v221_v27 = vld [vmem:[#allocation5 + $0x4b8] sm:$0xff]  ;;  %v223_v36 = vld [vmem:[#allocation5 + $0x4c8] sm:$0xff] }
  0x68   :  { %1475 = vmatpush1.bf16.msra.mxu1 %v1474_v20  ;;  %1349 = vmatprep.subr.bf16.mxu0 %v1348_v21  ;;  %v210_v20 = vld [vmem:[#allocation5 + $0x460] sm:$0xff]  ;;  %v208_v21 = vld [vmem:[#allocation5 + $0x450] sm:$0xff]  ;;  %v1500_v34 = vpack.c.bf16 %v221_v27, %v217_v26  ;;  %v225_v38 = vld [vmem:[#allocation5 + $0x4d8] sm:$0xff] }
  0x69   :  { %1477 = vmatprep.subr.bf16.mxu1 %v1476_v25  ;;  %v219_v25 = vld [vmem:[#allocation5 + $0x4a8] sm:$0xff]  ;;  %v1370_v28 = vpack.c.bf16 %v210_v20, %v206_v19  ;;  %v1498_v29 = vpack.c.bf16 %v212_v23, %v208_v21  ;;  %v229_v39 = vld [vmem:[#allocation5 + $0x4f8] sm:$0xff]  ;;  %v228_v47 = vld [vmem:[#allocation5 + $0x4f0] sm:$0xff] }
  0x6a   :  { %v1372_v30 = vpack.c.bf16 %v219_v25, %v215_v24  ;;  %v1504_v46 = vpack.c.bf16 %v229_v39, %v225_v38  ;;  %v231_v48 = vld [vmem:[#allocation5 + $0x508] sm:$0xff]  ;;  %v233_v50 = vld [vmem:[#allocation5 + $0x518] sm:$0xff]  ;;  %v236_v59 = vld [vmem:[#allocation5 + $0x530] sm:$0xff] }
  0x6b   :  { %1351 = vmatpush1.bf16.msra.mxu0 %v1350_v31  ;;  %v214_v31 = vld [vmem:[#allocation5 + $0x480] sm:$0xff]  ;;  %v237_v51 = vld [vmem:[#allocation5 + $0x538] sm:$0xff]  ;;  %v239_v60 = vld [vmem:[#allocation5 + $0x548] sm:$0xff] }
  0x6c   :  { %1479 = vmatpush1.bf16.msra.mxu1 %v1478_v32  ;;  %1353 = vmatprep.subr.bf16.mxu0 %v1352_v33  ;;  %v218_v32 = vld [vmem:[#allocation5 + $0x4a0] sm:$0xff]  ;;  %v216_v33 = vld [vmem:[#allocation5 + $0x490] sm:$0xff]  ;;  %v1508_v58 = vpack.c.bf16 %v237_v51, %v233_v50  ;;  %v241_v62 = vld [vmem:[#allocation5 + $0x558] sm:$0xff] }
  0x6d   :  { %1481 = vmatprep.subr.bf16.mxu1 %v1480_v37  ;;  %v227_v37 = vld [vmem:[#allocation5 + $0x4e8] sm:$0xff]  ;;  %v1374_v40 = vpack.c.bf16 %v218_v32, %v214_v31  ;;  %v1502_v41 = vpack.c.bf16 %v220_v35, %v216_v33  ;;  %v245_v63 = vld [vmem:[#allocation5 + $0x578] sm:$0xff]  ;;  %v244_v7 = vld [vmem:[#allocation5 + $0x570] sm:$0xff] }
  0x6e   :  { %v1376_v42 = vpack.c.bf16 %v227_v37, %v223_v36  ;;  %v1512_v6 = vpack.c.bf16 %v245_v63, %v241_v62  ;;  %v247_v8 = vld [vmem:[#allocation5 + $0x588] sm:$0xff]  ;;  %v249_v10 = vld [vmem:[#allocation5 + $0x598] sm:$0xff]  ;;  %v246_v14 = vld [vmem:[#allocation5 + $0x580] sm:$0xff] }
  0x6f   :  { %1355 = vmatpush1.bf16.msra.mxu0 %v1354_v43  ;;  %v222_v43 = vld [vmem:[#allocation5 + $0x4c0] sm:$0xff]  ;;  %v253_v11 = vld [vmem:[#allocation5 + $0x5b8] sm:$0xff]  ;;  %v67_v12 = vld [vmem:[#allocation2 + $0x28] sm:$0xff] }
  0x70   :  { %1483 = vmatpush1.bf16.msra.mxu1 %v1482_v44  ;;  %1357 = vmatprep.subr.bf16.mxu0 %v1356_v45  ;;  %v226_v44 = vld [vmem:[#allocation5 + $0x4e0] sm:$0xff]  ;;  %v224_v45 = vld [vmem:[#allocation5 + $0x4d0] sm:$0xff]  ;;  %v1516_v21 = vpack.c.bf16 %v253_v11, %v249_v10  ;;  %v259_v23 = vld [vmem:[#allocation5 + $0x5e8] sm:$0xff] }
  0x71   :  { %1485 = vmatprep.subr.bf16.mxu1 %v1484_v49  ;;  %v235_v49 = vld [vmem:[#allocation5 + $0x528] sm:$0xff]  ;;  %v1378_v52 = vpack.c.bf16 %v226_v44, %v222_v43  ;;  %v1506_v53 = vpack.c.bf16 %v228_v47, %v224_v45  ;;  %v248_v19 = vld [vmem:[#allocation5 + $0x590] sm:$0xff]  ;;  %v65_v24 = vld [vmem:[#allocation2 + $0x18] sm:$0xff] }
  0x72   :  { %v1380_v54 = vpack.c.bf16 %v235_v49, %v231_v48  ;;  %v252_v20 = vld [vmem:[#allocation5 + $0x5b0] sm:$0xff]  ;;  %v257_v25 = vld [vmem:[#allocation5 + $0x5d8] sm:$0xff]  ;;  %v258_v31 = vld [vmem:[#allocation5 + $0x5e0] sm:$0xff] }
  0x73   :  { %1359 = vmatpush1.bf16.msra.mxu0 %v1358_v55  ;;  %v230_v55 = vld [vmem:[#allocation5 + $0x500] sm:$0xff]  ;;  %v261_v26 = vld [vmem:[#allocation5 + $0x5f8] sm:$0xff]  ;;  %v256_v32 = vld [vmem:[#allocation5 + $0x5d0] sm:$0xff] }
  0x74   :  { %1487 = vmatpush1.bf16.msra.mxu1 %v1486_v56  ;;  %1361 = vmatprep.subr.bf16.mxu0 %v1360_v57  ;;  %v234_v56 = vld [vmem:[#allocation5 + $0x520] sm:$0xff]  ;;  %v232_v57 = vld [vmem:[#allocation5 + $0x510] sm:$0xff]  ;;  %v1520_v33 = vpack.c.bf16 %v261_v26, %v257_v25  ;;  %v263_v35 = vld [vmem:[#allocation5 + $0x608] sm:$0xff] }
  0x75   :  { %1489 = vmatprep.subr.bf16.mxu1 %v1488_v61  ;;  %v243_v61 = vld [vmem:[#allocation5 + $0x568] sm:$0xff]  ;;  %v1382_v0 = vpack.c.bf16 %v234_v56, %v230_v55  ;;  %v1510_v1 = vpack.c.bf16 %v236_v59, %v232_v57  ;;  %v265_v37 = vld [vmem:[#allocation5 + $0x618] sm:$0xff]  ;;  %v266_v43 = vld [vmem:[#allocation5 + $0x620] sm:$0xff] }
  0x76   :  { %v1384_v2 = vpack.c.bf16 %v243_v61, %v239_v60  ;;  %v267_v36 = vld [vmem:[#allocation5 + $0x628] sm:$0xff]  ;;  %v269_v38 = vld [vmem:[#allocation5 + $0x638] sm:$0xff]  ;;  %v264_v44 = vld [vmem:[#allocation5 + $0x610] sm:$0xff] }
  0x77   :  { %1363 = vmatpush1.bf16.msra.mxu0 %v1362_v3  ;;  %v238_v3 = vld [vmem:[#allocation5 + $0x540] sm:$0xff]  ;;  %v1524_v45 = vpack.c.bf16 %v269_v38, %v265_v37  ;;  %v271_v47 = vld [vmem:[#allocation5 + $0x648] sm:$0xff]  ;;  %v273_v49 = vld [vmem:[#allocation5 + $0x658] sm:$0xff] }
  0x78   :  { %1491 = vmatpush1.bf16.msra.mxu1 %v1490_v4  ;;  %1365 = vmatprep.subr.bf16.mxu0 %v1364_v5  ;;  %v242_v4 = vld [vmem:[#allocation5 + $0x560] sm:$0xff]  ;;  %v240_v5 = vld [vmem:[#allocation5 + $0x550] sm:$0xff]  ;;  %v275_v48 = vld [vmem:[#allocation5 + $0x668] sm:$0xff] }
  0x79   :  { %1493 = vmatprep.subr.bf16.mxu1 %v1492_v9  ;;  %v251_v9 = vld [vmem:[#allocation5 + $0x5a8] sm:$0xff]  ;;  %v1386_v13 = vpack.c.bf16 %v242_v4, %v238_v3  ;;  %v277_v50 = vld [vmem:[#allocation5 + $0x678] sm:$0xff]  ;;  %v274_v55 = vld [vmem:[#allocation5 + $0x660] sm:$0xff] }
  0x7a   :  { %413 = vmatmul.mubr.f32.vlgmr.msra.gmra.mrb[0].mxu0 %v62_v15  ;;  %v272_v56 = vld [vmem:[#allocation5 + $0x650] sm:$0xff]  ;;  %v1528_v57 = vpack.c.bf16 %v277_v50, %v273_v49  ;;  %v279_v59 = vld [vmem:[#allocation5 + $0x688] sm:$0xff]  ;;  %v281_v61 = vld [vmem:[#allocation5 + $0x698] sm:$0xff] }
  0x7b   :  { %1367 = vmatpush1.bf16.msra.mxu0 %v1366_v16  ;;  %567 = vmatmul.mubr.f32.vlgmr.msra.gmra.mrb[0].mxu1 %v62_v15  ;;  %v66_v15 = vld [vmem:[#allocation2 + $0x20] sm:$0xff]  ;;  %v1514_v16 = vpack.c.bf16 %v244_v7, %v240_v5  ;;  %v283_v60 = vld [vmem:[#allocation5 + $0x6a8] sm:$0xff]  ;;  %v285_v62 = vld [vmem:[#allocation5 + $0x6b8] sm:$0xff] }
  0x7c   :  { %1495 = vmatpush1.bf16.msra.mxu1 %v1494_v17  ;;  %1369 = vmatprep.subr.bf16.mxu0 %v1368_v18  ;;  %v1388_v17 = vpack.c.bf16 %v251_v9, %v247_v8  ;;  %v250_v18 = vld [vmem:[#allocation5 + $0x5a0] sm:$0xff]  ;;  %v280_v4 = vld [vmem:[#allocation5 + $0x690] sm:$0xff]  ;;  %v1532_v5 = vpack.c.bf16 %v285_v62, %v281_v61  ;;  %v287_v7 = vld [vmem:[#allocation5 + $0x6c8] sm:$0xff] }
  0x7d   :  { %1497 = vmatprep.subr.bf16.mxu1 %v1496_v22  ;;  %418 = vmatprep.mubr.f32.mxu0 %v67_v12  ;;  %v255_v22 = vld [vmem:[#allocation5 + $0x5c8] sm:$0xff]  ;;  %v1390_v27 = vpack.c.bf16 %v250_v18, %v246_v14  ;;  %v282_v3 = vld [vmem:[#allocation5 + $0x6a0] sm:$0xff]  ;;  %v289_v9 = vld [vmem:[#allocation5 + $0x6d8] sm:$0xff] }
  0x7e   :  { %572 = vmatprep.mubr.f32.mxu1 %v67_v12  ;;  %419 = vmatmul.mubr.f32.gmra.mrb[2].mxu0 %v66_v15  ;;  %v291_v8 = vld [vmem:[#allocation5 + $0x6e8] sm:$0xff]  ;;  %v293_v10 = vld [vmem:[#allocation5 + $0x6f8] sm:$0xff]  ;;  %v286_v14 = vld [vmem:[#allocation5 + $0x6c0] sm:$0xff] }
  0x7f   :  { %1371 = vmatpush1.bf16.msra.mxu0 %v1370_v28  ;;  %573 = vmatmul.mubr.f32.gmra.mrb[2].mxu1 %v66_v15  ;;  %v1518_v28 = vpack.c.bf16 %v252_v20, %v248_v19  ;;  %v290_v15 = vld [vmem:[#allocation5 + $0x6e0] sm:$0xff]  ;;  %v292_v18 = vld [vmem:[#allocation5 + $0x6f0] sm:$0xff]  ;;  %v295_v19 = vld [vmem:[#allocation5 + $0x708] sm:$0xff] }
  0x80   :  { %1499 = vmatpush1.bf16.msra.mxu1 %v1498_v29  ;;  %1373 = vmatprep.subr.bf16.mxu0 %v1372_v30  ;;  %v1392_v29 = vpack.c.bf16 %v259_v23, %v255_v22  ;;  %v254_v30 = vld [vmem:[#allocation5 + $0x5c0] sm:$0xff]  ;;  %v299_v20 = vld [vmem:[#allocation5 + $0x728] sm:$0xff]  ;;  %v301_v22 = vld [vmem:[#allocation5 + $0x738] sm:$0xff]  ;;  %v1410_v23 = vpack.c.bf16 %v290_v15, %v286_v14 }
  0x81   :  { %1501 = vmatprep.subr.bf16.mxu1 %v1500_v34  ;;  %489 = vmatprep.mubr.f32.mxu0 %v65_v24  ;;  %v260_v34 = vld [vmem:[#allocation5 + $0x5f0] sm:$0xff]  ;;  %v1394_v39 = vpack.c.bf16 %v258_v31, %v254_v30  ;;  %v1412_v25 = vpack.c.bf16 %v299_v20, %v295_v19  ;;  %v294_v26 = vld [vmem:[#allocation5 + $0x700] sm:$0xff]  ;;  %v303_v31 = vld [vmem:[#allocation5 + $0x748] sm:$0xff] }
  0x82   :  { %643 = vmatprep.mubr.f32.mxu1 %v65_v24  ;;  %v300_v30 = vld [vmem:[#allocation5 + $0x730] sm:$0xff]  ;;  %v302_v38 = vld [vmem:[#allocation5 + $0x740] sm:$0xff]  ;;  %v697_v15 = vld [vmem:[#allocation7 + $0x48] sm:$0xff] }
  0x83   :  { %1375 = vmatpush1.bf16.msra.mxu0 %v1374_v40  ;;  %v1522_v40 = vpack.c.bf16 %v260_v34, %v256_v32  ;;  %v307_v32 = vld [vmem:[#allocation5 + $0x768] sm:$0xff]  ;;  %v309_v34 = vld [vmem:[#allocation5 + $0x778] sm:$0xff]  ;;  %v310_v50 = vld [vmem:[#allocation5 + $0x780] sm:$0xff] }
  0x84   :  { %1503 = vmatpush1.bf16.msra.mxu1 %v1502_v41  ;;  %1377 = vmatprep.subr.bf16.mxu0 %v1376_v42  ;;  %v1396_v41 = vpack.c.bf16 %v267_v36, %v263_v35  ;;  %v262_v42 = vld [vmem:[#allocation5 + $0x600] sm:$0xff]  ;;  %v1416_v37 = vpack.c.bf16 %v307_v32, %v303_v31  ;;  %v694_v14 = vld [vmem:[#allocation7 + $0x30] sm:$0xff]  ;;  %v703_v19 = vld [vmem:[#allocation7 + $0x78] sm:$0xff] }
  0x85   :  { %1505 = vmatprep.subr.bf16.mxu1 %v1504_v46  ;;  %v268_v46 = vld [vmem:[#allocation5 + $0x630] sm:$0xff]  ;;  %v1398_v51 = vpack.c.bf16 %v266_v43, %v262_v42  ;;  %v311_v43 = vld [vmem:[#allocation5 + $0x788] sm:$0xff]  ;;  %v318_v62 = vld [vmem:[#allocation5 + $0x7c0] sm:$0xff] }
  0x86   :  { %v308_v42 = vld [vmem:[#allocation5 + $0x770] sm:$0xff]  ;;  %v69_v20 = vld [vmem:[#allocation2 + $0x38] sm:$0xff] }
  0x87   :  { %1379 = vmatpush1.bf16.msra.mxu0 %v1378_v52  ;;  %v1526_v52 = vpack.c.bf16 %v268_v46, %v264_v44  ;;  %v315_v44 = vld [vmem:[#allocation5 + $0x7a8] sm:$0xff]  ;;  %v317_v46 = vld [vmem:[#allocation5 + $0x7b8] sm:$0xff]  ;;  %v68_v31 = vld [vmem:[#allocation2 + $0x30] sm:$0xff] }
  0x88   :  { %1507 = vmatpush1.bf16.msra.mxu1 %v1506_v53  ;;  %1381 = vmatprep.subr.bf16.mxu0 %v1380_v54  ;;  %v1400_v53 = vpack.c.bf16 %v275_v48, %v271_v47  ;;  %v270_v54 = vld [vmem:[#allocation5 + $0x640] sm:$0xff]  ;;  %v1420_v49 = vpack.c.bf16 %v315_v44, %v311_v43  ;;  %v707_v32 = vld [vmem:[#allocation7 + $0x98] sm:$0xff]  ;;  %v717_v43 = vld [vmem:[#allocation7 + $0xe8] sm:$0xff] }
  0x89   :  { %1509 = vmatprep.subr.bf16.mxu1 %v1508_v58  ;;  %v276_v58 = vld [vmem:[#allocation5 + $0x670] sm:$0xff]  ;;  %v1402_v63 = vpack.c.bf16 %v274_v55, %v270_v54  ;;  %v319_v55 = vld [vmem:[#allocation5 + $0x7c8] sm:$0xff]  ;;  %v715_v44 = vld [vmem:[#allocation7 + $0xd8] sm:$0xff] }
  0x8a   :  { %v316_v54 = vld [vmem:[#allocation5 + $0x7b0] sm:$0xff] }
  0x8b   :  { %1383 = vmatpush1.bf16.msra.mxu0 %v1382_v0  ;;  %v1530_v0 = vpack.c.bf16 %v276_v58, %v272_v56  ;;  %v323_v56 = vld [vmem:[#allocation5 + $0x7e8] sm:$0xff]  ;;  %v325_v58 = vld [vmem:[#allocation5 + $0x7f8] sm:$0xff] }
  0x8c   :  { %1511 = vmatpush1.bf16.msra.mxu1 %v1510_v1  ;;  %1385 = vmatprep.subr.bf16.mxu0 %v1384_v2  ;;  %v1404_v1 = vpack.c.bf16 %v283_v60, %v279_v59  ;;  %v278_v2 = vld [vmem:[#allocation5 + $0x680] sm:$0xff]  ;;  %v1424_v61 = vpack.c.bf16 %v323_v56, %v319_v55  ;;  %v725_v55 = vld [vmem:[#allocation7 + $0x128] sm:$0xff]  ;;  %v723_v56 = vld [vmem:[#allocation7 + $0x118] sm:$0xff] }
  0x8d   :  { %1513 = vmatprep.subr.bf16.mxu1 %v1512_v6  ;;  %v284_v6 = vld [vmem:[#allocation5 + $0x6b0] sm:$0xff]  ;;  %v1406_v11 = vpack.c.bf16 %v282_v3, %v278_v2  ;;  %v689_v3 = vld [vmem:[#allocation7 + $0x8] sm:$0xff] }
  0x8e   :  { %v1534_v12 = vpack.c.bf16 %v284_v6, %v280_v4  ;;  %v324_v2 = vld [vmem:[#allocation5 + $0x7f0] sm:$0xff]  ;;  %v693_v4 = vld [vmem:[#allocation7 + $0x28] sm:$0xff]  ;;  %v695_v6 = vld [vmem:[#allocation7 + $0x38] sm:$0xff] }
  0x8f   :  { %1387 = vmatpush1.bf16.msra.mxu0 %v1386_v13  ;;  %v1408_v13 = vpack.c.bf16 %v291_v8, %v287_v7 }
  0x90   :  { %1515 = vmatpush1.bf16.msra.mxu1 %v1514_v16  ;;  %1389 = vmatprep.subr.bf16.mxu0 %v1388_v17  ;;  %v288_v16 = vld [vmem:[#allocation5 + $0x6d0] sm:$0xff]  ;;  %v1536_v17 = vpack.c.bf16 %v293_v10, %v289_v9  ;;  %v1556_v9 = vpack.c.bf16 %v693_v4, %v689_v3  ;;  %v733_v3 = vld [vmem:[#allocation7 + $0x168] sm:$0xff]  ;;  %v731_v4 = vld [vmem:[#allocation7 + $0x158] sm:$0xff] }
  0x91   :  { %1517 = vmatprep.subr.bf16.mxu1 %v1516_v21  ;;  %v297_v21 = vld [vmem:[#allocation5 + $0x718] sm:$0xff]  ;;  %v1538_v24 = vpack.c.bf16 %v292_v18, %v288_v16  ;;  %v701_v16 = vld [vmem:[#allocation7 + $0x68] sm:$0xff] }
  0x92   :  { %v699_v18 = vld [vmem:[#allocation7 + $0x58] sm:$0xff] }
  0x93   :  { %1391 = vmatpush1.bf16.msra.mxu0 %v1390_v27  ;;  %v298_v27 = vld [vmem:[#allocation5 + $0x720] sm:$0xff] }
  0x94   :  { %1519 = vmatpush1.bf16.msra.mxu1 %v1518_v28  ;;  %1393 = vmatprep.subr.bf16.mxu0 %v1392_v29  ;;  %v296_v28 = vld [vmem:[#allocation5 + $0x710] sm:$0xff]  ;;  %v1540_v29 = vpack.c.bf16 %v301_v22, %v297_v21  ;;  %v1414_v35 = vpack.c.bf16 %v298_v27, %v294_v26  ;;  %v1688_v27 = vpack.c.bf16 %v703_v19, %v699_v18 }
  0x95   :  { %1521 = vmatprep.subr.bf16.mxu1 %v1520_v33  ;;  %v305_v33 = vld [vmem:[#allocation5 + $0x758] sm:$0xff]  ;;  %v1542_v36 = vpack.c.bf16 %v300_v30, %v296_v28  ;;  %v698_v26 = vld [vmem:[#allocation7 + $0x50] sm:$0xff]  ;;  %v709_v30 = vld [vmem:[#allocation7 + $0xa8] sm:$0xff] }
  0x96   :  { %v702_v28 = vld [vmem:[#allocation7 + $0x70] sm:$0xff] }
  0x97   :  { %1395 = vmatpush1.bf16.msra.mxu0 %v1394_v39  ;;  %v306_v39 = vld [vmem:[#allocation5 + $0x760] sm:$0xff] }
  0x98   :  { %1523 = vmatpush1.bf16.msra.mxu1 %v1522_v40  ;;  %1397 = vmatprep.subr.bf16.mxu0 %v1396_v41  ;;  %v304_v40 = vld [vmem:[#allocation5 + $0x750] sm:$0xff]  ;;  %v1544_v41 = vpack.c.bf16 %v309_v34, %v305_v33  ;;  %v1418_v47 = vpack.c.bf16 %v306_v39, %v302_v38  ;;  %v711_v33 = vld [vmem:[#allocation7 + $0xb8] sm:$0xff]  ;;  %v708_v38 = vld [vmem:[#allocation7 + $0xa0] sm:$0xff] }
  0x99   :  { %1525 = vmatprep.subr.bf16.mxu1 %v1524_v45  ;;  %v313_v45 = vld [vmem:[#allocation5 + $0x798] sm:$0xff]  ;;  %v1546_v48 = vpack.c.bf16 %v308_v42, %v304_v40  ;;  %v706_v39 = vld [vmem:[#allocation7 + $0x90] sm:$0xff]  ;;  %v1692_v40 = vpack.c.bf16 %v711_v33, %v707_v32  ;;  %v713_v42 = vld [vmem:[#allocation7 + $0xc8] sm:$0xff] }
  0x9a   :  { %v744_v33 = vld [vmem:[#allocation7 + $0x1c0] sm:$0xff] }
  0x9b   :  { %1399 = vmatpush1.bf16.msra.mxu0 %v1398_v51  ;;  %v314_v51 = vld [vmem:[#allocation5 + $0x7a0] sm:$0xff] }
  0x9c   :  { %1527 = vmatpush1.bf16.msra.mxu1 %v1526_v52  ;;  %1401 = vmatprep.subr.bf16.mxu0 %v1400_v53  ;;  %v312_v52 = vld [vmem:[#allocation5 + $0x790] sm:$0xff]  ;;  %v1548_v53 = vpack.c.bf16 %v317_v46, %v313_v45  ;;  %v1422_v59 = vpack.c.bf16 %v314_v51, %v310_v50  ;;  %v719_v45 = vld [vmem:[#allocation7 + $0xf8] sm:$0xff]  ;;  %v716_v50 = vld [vmem:[#allocation7 + $0xe0] sm:$0xff] }
  0x9d   :  { %1529 = vmatprep.subr.bf16.mxu1 %v1528_v57  ;;  %v321_v57 = vld [vmem:[#allocation5 + $0x7d8] sm:$0xff]  ;;  %v1550_v60 = vpack.c.bf16 %v316_v54, %v312_v52  ;;  %v714_v51 = vld [vmem:[#allocation7 + $0xd0] sm:$0xff]  ;;  %v1696_v52 = vpack.c.bf16 %v719_v45, %v715_v44  ;;  %v721_v54 = vld [vmem:[#allocation7 + $0x108] sm:$0xff] }
  0x9e   :  { %v752_v45 = vld [vmem:[#allocation7 + $0x200] sm:$0xff] }
  0x9f   :  { %1403 = vmatpush1.bf16.msra.mxu0 %v1402_v63  ;;  %v322_v63 = vld [vmem:[#allocation5 + $0x7e0] sm:$0xff] }
  0xa0   :  { %1531 = vmatpush1.bf16.msra.mxu1 %v1530_v0  ;;  %1405 = vmatprep.subr.bf16.mxu0 %v1404_v1  ;;  %v320_v0 = vld [vmem:[#allocation5 + $0x7d0] sm:$0xff]  ;;  %v1552_v1 = vpack.c.bf16 %v325_v58, %v321_v57  ;;  %v1426_v7 = vpack.c.bf16 %v322_v63, %v318_v62  ;;  %v727_v57 = vld [vmem:[#allocation7 + $0x138] sm:$0xff]  ;;  %v724_v62 = vld [vmem:[#allocation7 + $0x120] sm:$0xff] }
  0xa1   :  { %1533 = vmatprep.subr.bf16.mxu1 %v1532_v5  ;;  %v691_v5 = vld [vmem:[#allocation7 + $0x18] sm:$0xff]  ;;  %v1554_v8 = vpack.c.bf16 %v324_v2, %v320_v0  ;;  %v722_v63 = vld [vmem:[#allocation7 + $0x110] sm:$0xff]  ;;  %v1700_v0 = vpack.c.bf16 %v727_v57, %v723_v56  ;;  %v729_v2 = vld [vmem:[#allocation7 + $0x148] sm:$0xff] }
  0xa2   :  { %v1684_v10 = vpack.c.bf16 %v695_v6, %v691_v5  ;;  %v735_v5 = vld [vmem:[#allocation7 + $0x178] sm:$0xff]  ;;  %v760_v57 = vld [vmem:[#allocation7 + $0x240] sm:$0xff] }
  0xa3   :  { %1407 = vmatpush1.bf16.msra.mxu0 %v1406_v11  ;;  %v688_v11 = vld [vmem:[#allocation7] sm:$0xff] }
  0xa4   :  { %1535 = vmatpush1.bf16.msra.mxu1 %v1534_v12  ;;  %1409 = vmatprep.subr.bf16.mxu0 %v1408_v13  ;;  %v692_v12 = vld [vmem:[#allocation7 + $0x20] sm:$0xff]  ;;  %v690_v13 = vld [vmem:[#allocation7 + $0x10] sm:$0xff] }
  0xa5   :  { %1537 = vmatprep.subr.bf16.mxu1 %v1536_v17  ;;  %v64_v17 = vld [vmem:[#allocation2 + $0x10] sm:$0xff]  ;;  %v1558_v21 = vpack.c.bf16 %v692_v12, %v688_v11  ;;  %v1686_v22 = vpack.c.bf16 %v694_v14, %v690_v13  ;;  %v1704_v12 = vpack.c.bf16 %v735_v5, %v731_v4  ;;  %v737_v14 = vld [vmem:[#allocation7 + $0x188] sm:$0xff]  ;;  %v768_v5 = vld [vmem:[#allocation7 + $0x280] sm:$0xff] }
  0xa6   :  { %v730_v11 = vld [vmem:[#allocation7 + $0x150] sm:$0xff] }
  0xa7   :  { %1411 = vmatpush1.bf16.msra.mxu0 %v1410_v23  ;;  %v1560_v23 = vpack.c.bf16 %v701_v16, %v697_v15  ;;  %v734_v13 = vld [vmem:[#allocation7 + $0x170] sm:$0xff]  ;;  %v741_v15 = vld [vmem:[#allocation7 + $0x1a8] sm:$0xff]  ;;  %v739_v16 = vld [vmem:[#allocation7 + $0x198] sm:$0xff] }
  0xa8   :  { %1539 = vmatpush1.bf16.msra.mxu1 %v1538_v24  ;;  %1413 = vmatprep.subr.bf16.mxu0 %v1412_v25  ;;  %v696_v24 = vld [vmem:[#allocation7 + $0x40] sm:$0xff]  ;;  %v1706_v19 = vpack.c.bf16 %v734_v13, %v730_v11  ;;  %v781_v13 = vld [vmem:[#allocation7 + $0x2e8] sm:$0xff] }
  0xa9   :  { %1541 = vmatprep.subr.bf16.mxu1 %v1540_v29  ;;  %v700_v25 = vld [vmem:[#allocation7 + $0x60] sm:$0xff]  ;;  %v705_v29 = vld [vmem:[#allocation7 + $0x88] sm:$0xff] }
  0xaa   :  { %v1562_v34 = vpack.c.bf16 %v700_v25, %v696_v24  ;;  %v742_v25 = vld [vmem:[#allocation7 + $0x1b0] sm:$0xff] }
  0xab   :  { %1415 = vmatpush1.bf16.msra.mxu0 %v1414_v35  ;;  %v1690_v35 = vpack.c.bf16 %v702_v28, %v698_v26  ;;  %v745_v26 = vld [vmem:[#allocation7 + $0x1c8] sm:$0xff]  ;;  %v747_v28 = vld [vmem:[#allocation7 + $0x1d8] sm:$0xff] }
  0xac   :  { %1543 = vmatpush1.bf16.msra.mxu1 %v1542_v36  ;;  %1417 = vmatprep.subr.bf16.mxu0 %v1416_v37  ;;  %v1564_v36 = vpack.c.bf16 %v709_v30, %v705_v29  ;;  %v704_v37 = vld [vmem:[#allocation7 + $0x80] sm:$0xff]  ;;  %v751_v29 = vld [vmem:[#allocation7 + $0x1f8] sm:$0xff] }
  0xad   :  { %1545 = vmatprep.subr.bf16.mxu1 %v1544_v41  ;;  %v710_v41 = vld [vmem:[#allocation7 + $0xb0] sm:$0xff]  ;;  %v1566_v46 = vpack.c.bf16 %v708_v38, %v704_v37  ;;  %v753_v38 = vld [vmem:[#allocation7 + $0x208] sm:$0xff] }
  0xae   :  { %v750_v37 = vld [vmem:[#allocation7 + $0x1f0] sm:$0xff] }
  0xaf   :  { %1419 = vmatpush1.bf16.msra.mxu0 %v1418_v47  ;;  %v1694_v47 = vpack.c.bf16 %v710_v41, %v706_v39  ;;  %v757_v39 = vld [vmem:[#allocation7 + $0x228] sm:$0xff]  ;;  %v759_v41 = vld [vmem:[#allocation7 + $0x238] sm:$0xff] }
  0xb0   :  { %1547 = vmatpush1.bf16.msra.mxu1 %v1546_v48  ;;  %1421 = vmatprep.subr.bf16.mxu0 %v1420_v49  ;;  %v1568_v48 = vpack.c.bf16 %v717_v43, %v713_v42  ;;  %v712_v49 = vld [vmem:[#allocation7 + $0xc0] sm:$0xff]  ;;  %v1588_v44 = vpack.c.bf16 %v757_v39, %v753_v38  ;;  %v795_v38 = vld [vmem:[#allocation7 + $0x358] sm:$0xff] }
  0xb1   :  { %1549 = vmatprep.subr.bf16.mxu1 %v1548_v53  ;;  %v718_v53 = vld [vmem:[#allocation7 + $0xf0] sm:$0xff]  ;;  %v1570_v58 = vpack.c.bf16 %v716_v50, %v712_v49  ;;  %v761_v50 = vld [vmem:[#allocation7 + $0x248] sm:$0xff] }
  0xb2   :  { %v758_v49 = vld [vmem:[#allocation7 + $0x230] sm:$0xff] }
  0xb3   :  { %1423 = vmatpush1.bf16.msra.mxu0 %v1422_v59  ;;  %v1698_v59 = vpack.c.bf16 %v718_v53, %v714_v51  ;;  %v765_v51 = vld [vmem:[#allocation7 + $0x268] sm:$0xff]  ;;  %v767_v53 = vld [vmem:[#allocation7 + $0x278] sm:$0xff] }
  0xb4   :  { %1551 = vmatpush1.bf16.msra.mxu1 %v1550_v60  ;;  %1425 = vmatprep.subr.bf16.mxu0 %v1424_v61  ;;  %v1572_v60 = vpack.c.bf16 %v725_v55, %v721_v54  ;;  %v720_v61 = vld [vmem:[#allocation7 + $0x100] sm:$0xff]  ;;  %v1592_v56 = vpack.c.bf16 %v765_v51, %v761_v50  ;;  %v803_v50 = vld [vmem:[#allocation7 + $0x398] sm:$0xff] }
  0xb5   :  { %1553 = vmatprep.subr.bf16.mxu1 %v1552_v1  ;;  %v726_v1 = vld [vmem:[#allocation7 + $0x130] sm:$0xff]  ;;  %v1574_v6 = vpack.c.bf16 %v724_v62, %v720_v61  ;;  %v769_v62 = vld [vmem:[#allocation7 + $0x288] sm:$0xff] }
  0xb6   :  { %v766_v61 = vld [vmem:[#allocation7 + $0x270] sm:$0xff] }
  0xb7   :  { %1427 = vmatpush1.bf16.msra.mxu0 %v1426_v7  ;;  %v1702_v7 = vpack.c.bf16 %v726_v1, %v722_v63  ;;  %v773_v63 = vld [vmem:[#allocation7 + $0x2a8] sm:$0xff]  ;;  %v775_v1 = vld [vmem:[#allocation7 + $0x2b8] sm:$0xff] }
  0xb8   :  { %1555 = vmatpush1.bf16.msra.mxu1 %v1554_v8  ;;  %1557 = vmatprep.subr.bf16.mxu0 %v1556_v9  ;;  %v1576_v8 = vpack.c.bf16 %v733_v3, %v729_v2  ;;  %v728_v9 = vld [vmem:[#allocation7 + $0x140] sm:$0xff]  ;;  %v1596_v4 = vpack.c.bf16 %v773_v63, %v769_v62  ;;  %v811_v62 = vld [vmem:[#allocation7 + $0x3d8] sm:$0xff] }
  0xb9   :  { %1685 = vmatprep.subr.bf16.mxu1 %v1684_v10  ;;  %v732_v10 = vld [vmem:[#allocation7 + $0x160] sm:$0xff] }
  0xba   :  { %490 = vmatmul.mubr.f32.vlgmr.msra.gmra.mrb[0].mxu0 %v64_v17  ;;  %v1578_v18 = vpack.c.bf16 %v732_v10, %v728_v9  ;;  %v774_v9 = vld [vmem:[#allocation7 + $0x2b0] sm:$0xff] }
  0xbb   :  { %644 = vmatmul.mubr.f32.vlgmr.msra.gmra.mrb[0].mxu1 %v64_v17  ;;  %495 = vmatprep.mubr.f32.mxu0 %v69_v20  ;;  %v743_v17 = vld [vmem:[#allocation7 + $0x1b8] sm:$0xff] }
  0xbc   :  { %649 = vmatprep.mubr.f32.mxu1 %v69_v20  ;;  %1559 = vmatpush1.bf16.msra.mxu0 %v1558_v21  ;;  %v1580_v20 = vpack.c.bf16 %v741_v15, %v737_v14  ;;  %v736_v21 = vld [vmem:[#allocation7 + $0x180] sm:$0xff]  ;;  %v1708_v24 = vpack.c.bf16 %v743_v17, %v739_v16  ;;  %v779_v14 = vld [vmem:[#allocation7 + $0x2d8] sm:$0xff] }
  0xbd   :  { %1687 = vmatpush1.bf16.msra.mxu1 %v1686_v22  ;;  %1561 = vmatprep.subr.bf16.mxu0 %v1560_v23  ;;  %v740_v22 = vld [vmem:[#allocation7 + $0x1a0] sm:$0xff]  ;;  %v738_v23 = vld [vmem:[#allocation7 + $0x190] sm:$0xff]  ;;  %v783_v16 = vld [vmem:[#allocation7 + $0x2f8] sm:$0xff] }
  0xbe   :  { %496 = vmatmul.mubr.f32.gmra.mrb[2].mxu0 %v68_v31  ;;  %1689 = vmatprep.subr.bf16.mxu1 %v1688_v27  ;;  %v749_v27 = vld [vmem:[#allocation7 + $0x1e8] sm:$0xff]  ;;  %v1582_v30 = vpack.c.bf16 %v740_v22, %v736_v21  ;;  %v776_v17 = vld [vmem:[#allocation7 + $0x2c0] sm:$0xff]  ;;  %v778_v21 = vld [vmem:[#allocation7 + $0x2d0] sm:$0xff] }
  0xbf   :  { %650 = vmatmul.mubr.f32.gmra.mrb[2].mxu1 %v68_v31  ;;  %v1710_v31 = vpack.c.bf16 %v742_v25, %v738_v23  ;;  %v1584_v32 = vpack.c.bf16 %v749_v27, %v745_v26  ;;  %v782_v22 = vld [vmem:[#allocation7 + $0x2f0] sm:$0xff]  ;;  %v789_v25 = vld [vmem:[#allocation7 + $0x328] sm:$0xff]  ;;  %v787_v26 = vld [vmem:[#allocation7 + $0x318] sm:$0xff] }
  0xc0   :  { %1563 = vmatpush1.bf16.msra.mxu0 %v1562_v34  ;;  %v748_v34 = vld [vmem:[#allocation7 + $0x1e0] sm:$0xff]  ;;  %v1730_v23 = vpack.c.bf16 %v782_v22, %v778_v21 }
  0xc1   :  { %1691 = vmatpush1.bf16.msra.mxu1 %v1690_v35  ;;  %1565 = vmatprep.subr.bf16.mxu0 %v1564_v36  ;;  %v746_v35 = vld [vmem:[#allocation7 + $0x1d0] sm:$0xff]  ;;  %v1712_v36 = vpack.c.bf16 %v751_v29, %v747_v28  ;;  %v1586_v42 = vpack.c.bf16 %v748_v34, %v744_v33  ;;  %v791_v28 = vld [vmem:[#allocation7 + $0x338] sm:$0xff]  ;;  %v784_v29 = vld [vmem:[#allocation7 + $0x300] sm:$0xff] }
  0xc2   :  { %1693 = vmatprep.subr.bf16.mxu1 %v1692_v40  ;;  %v755_v40 = vld [vmem:[#allocation7 + $0x218] sm:$0xff]  ;;  %v1714_v43 = vpack.c.bf16 %v750_v37, %v746_v35  ;;  %v786_v33 = vld [vmem:[#allocation7 + $0x310] sm:$0xff]  ;;  %v797_v37 = vld [vmem:[#allocation7 + $0x368] sm:$0xff] }
  0xc3   :  { %v790_v34 = vld [vmem:[#allocation7 + $0x330] sm:$0xff] }
  0xc4   :  { %1567 = vmatpush1.bf16.msra.mxu0 %v1566_v46  ;;  %v756_v46 = vld [vmem:[#allocation7 + $0x220] sm:$0xff]  ;;  %v1734_v35 = vpack.c.bf16 %v790_v34, %v786_v33 }
  0xc5   :  { %1695 = vmatpush1.bf16.msra.mxu1 %v1694_v47  ;;  %1569 = vmatprep.subr.bf16.mxu0 %v1568_v48  ;;  %v754_v47 = vld [vmem:[#allocation7 + $0x210] sm:$0xff]  ;;  %v1716_v48 = vpack.c.bf16 %v759_v41, %v755_v40  ;;  %v1590_v54 = vpack.c.bf16 %v756_v46, %v752_v45  ;;  %v799_v40 = vld [vmem:[#allocation7 + $0x378] sm:$0xff]  ;;  %v792_v41 = vld [vmem:[#allocation7 + $0x340] sm:$0xff] }
  0xc6   :  { %1697 = vmatprep.subr.bf16.mxu1 %v1696_v52  ;;  %v763_v52 = vld [vmem:[#allocation7 + $0x258] sm:$0xff]  ;;  %v1718_v55 = vpack.c.bf16 %v758_v49, %v754_v47  ;;  %v794_v45 = vld [vmem:[#allocation7 + $0x350] sm:$0xff]  ;;  %v805_v49 = vld [vmem:[#allocation7 + $0x3a8] sm:$0xff] }
  0xc7   :  { %v798_v46 = vld [vmem:[#allocation7 + $0x370] sm:$0xff] }
  0xc8   :  { %1571 = vmatpush1.bf16.msra.mxu0 %v1570_v58  ;;  %v764_v58 = vld [vmem:[#allocation7 + $0x260] sm:$0xff]  ;;  %v1738_v47 = vpack.c.bf16 %v798_v46, %v794_v45  ;;  %v818_v46 = vld [vmem:[#allocation7 + $0x410] sm:$0xff] }
  0xc9   :  { %1699 = vmatpush1.bf16.msra.mxu1 %v1698_v59  ;;  %1573 = vmatprep.subr.bf16.mxu0 %v1572_v60  ;;  %v762_v59 = vld [vmem:[#allocation7 + $0x250] sm:$0xff]  ;;  %v1720_v60 = vpack.c.bf16 %v767_v53, %v763_v52  ;;  %v1594_v2 = vpack.c.bf16 %v764_v58, %v760_v57  ;;  %v807_v52 = vld [vmem:[#allocation7 + $0x3b8] sm:$0xff]  ;;  %v800_v53 = vld [vmem:[#allocation7 + $0x380] sm:$0xff] }
  0xca   :  { %1701 = vmatprep.subr.bf16.mxu1 %v1700_v0  ;;  %v771_v0 = vld [vmem:[#allocation7 + $0x298] sm:$0xff]  ;;  %v1722_v3 = vpack.c.bf16 %v766_v61, %v762_v59  ;;  %v802_v57 = vld [vmem:[#allocation7 + $0x390] sm:$0xff]  ;;  %v813_v61 = vld [vmem:[#allocation7 + $0x3e8] sm:$0xff] }
  0xcb   :  { %v806_v58 = vld [vmem:[#allocation7 + $0x3b0] sm:$0xff]  ;;  %v820_v45 = vld [vmem:[#allocation7 + $0x420] sm:$0xff] }
  0xcc   :  { %1575 = vmatpush1.bf16.msra.mxu0 %v1574_v6  ;;  %v772_v6 = vld [vmem:[#allocation7 + $0x2a0] sm:$0xff]  ;;  %v1742_v59 = vpack.c.bf16 %v806_v58, %v802_v57 }
  0xcd   :  { %1703 = vmatpush1.bf16.msra.mxu1 %v1702_v7  ;;  %1577 = vmatprep.subr.bf16.mxu0 %v1576_v8  ;;  %v1724_v7 = vpack.c.bf16 %v775_v1, %v771_v0  ;;  %v770_v8 = vld [vmem:[#allocation7 + $0x290] sm:$0xff]  ;;  %v1598_v10 = vpack.c.bf16 %v772_v6, %v768_v5  ;;  %v815_v0 = vld [vmem:[#allocation7 + $0x3f8] sm:$0xff]  ;;  %v808_v1 = vld [vmem:[#allocation7 + $0x3c0] sm:$0xff] }
  0xce   :  { %1705 = vmatprep.subr.bf16.mxu1 %v1704_v12  ;;  %v1726_v11 = vpack.c.bf16 %v774_v9, %v770_v8  ;;  %v777_v12 = vld [vmem:[#allocation7 + $0x2c8] sm:$0xff]  ;;  %v810_v5 = vld [vmem:[#allocation7 + $0x3d0] sm:$0xff] }
  0xcf   :  { %v1600_v15 = vpack.c.bf16 %v781_v13, %v777_v12  ;;  %v814_v6 = vld [vmem:[#allocation7 + $0x3f0] sm:$0xff]  ;;  %v817_v8 = vld [vmem:[#allocation7 + $0x408] sm:$0xff]  ;;  %v823_v12 = vld [vmem:[#allocation7 + $0x438] sm:$0xff] }
  0xd0   :  { %1579 = vmatpush1.bf16.msra.mxu0 %v1578_v18  ;;  %v780_v18 = vld [vmem:[#allocation7 + $0x2e0] sm:$0xff]  ;;  %v821_v9 = vld [vmem:[#allocation7 + $0x428] sm:$0xff] }
  0xd1   :  { %1707 = vmatpush1.bf16.msra.mxu1 %v1706_v19  ;;  %1581 = vmatprep.subr.bf16.mxu0 %v1580_v20  ;;  %v1728_v19 = vpack.c.bf16 %v783_v16, %v779_v14  ;;  %v1602_v20 = vpack.c.bf16 %v780_v18, %v776_v17  ;;  %v328_v14 = vlaneseq  ;;  %v2054_v17 = vld [vmem:[%s2112_s2] sm:$0xf] }
  0xd2   :  { %1709 = vmatprep.subr.bf16.mxu1 %v1708_v24  ;;  %v785_v24 = vld [vmem:[#allocation7 + $0x308] sm:$0xff] }
  0xd3   :  { %v1604_v27 = vpack.c.bf16 %v789_v25, %v785_v24 }
  0xd4   :  { %1583 = vmatpush1.bf16.msra.mxu0 %v1582_v30  ;;  %v788_v30 = vld [vmem:[#allocation7 + $0x320] sm:$0xff] }
  0xd5   :  { %1711 = vmatpush1.bf16.msra.mxu1 %v1710_v31  ;;  %1585 = vmatprep.subr.bf16.mxu0 %v1584_v32  ;;  %v1732_v31 = vpack.c.bf16 %v791_v28, %v787_v26  ;;  %v1606_v32 = vpack.c.bf16 %v788_v30, %v784_v29 }
  0xd6   :  { %1713 = vmatprep.subr.bf16.mxu1 %v1712_v36  ;;  %v793_v36 = vld [vmem:[#allocation7 + $0x348] sm:$0xff] }
  0xd7   :  { %v1608_v39 = vpack.c.bf16 %v797_v37, %v793_v36 }
  0xd8   :  { %1587 = vmatpush1.bf16.msra.mxu0 %v1586_v42  ;;  %v796_v42 = vld [vmem:[#allocation7 + $0x360] sm:$0xff] }
  0xd9   :  { %1715 = vmatpush1.bf16.msra.mxu1 %v1714_v43  ;;  %1589 = vmatprep.subr.bf16.mxu0 %v1588_v44  ;;  %v1736_v43 = vpack.c.bf16 %v799_v40, %v795_v38  ;;  %v1610_v44 = vpack.c.bf16 %v796_v42, %v792_v41  ;;  %v816_v42 = vld [vmem:[#allocation7 + $0x400] sm:$0xff] }
  0xda   :  { %1717 = vmatprep.subr.bf16.mxu1 %v1716_v48  ;;  %v801_v48 = vld [vmem:[#allocation7 + $0x388] sm:$0xff]  ;;  %v1622_v57 = vpack.c.bf16 %v820_v45, %v816_v42 }
  0xdb   :  { %v1612_v51 = vpack.c.bf16 %v805_v49, %v801_v48  ;;  %v853_v42 = vld [vmem:[#allocation7 + $0x528] sm:$0xff] }
  0xdc   :  { %1591 = vmatpush1.bf16.msra.mxu0 %v1590_v54  ;;  %v804_v54 = vld [vmem:[#allocation7 + $0x3a0] sm:$0xff] }
  0xdd   :  { %1719 = vmatpush1.bf16.msra.mxu1 %v1718_v55  ;;  %1593 = vmatprep.subr.bf16.mxu0 %v1592_v56  ;;  %v1740_v55 = vpack.c.bf16 %v807_v52, %v803_v50  ;;  %v1614_v56 = vpack.c.bf16 %v804_v54, %v800_v53  ;;  %v825_v50 = vld [vmem:[#allocation7 + $0x448] sm:$0xff]  ;;  %v827_v53 = vld [vmem:[#allocation7 + $0x458] sm:$0xff] }
  0xde   :  { %1721 = vmatprep.subr.bf16.mxu1 %v1720_v60  ;;  %v809_v60 = vld [vmem:[#allocation7 + $0x3c8] sm:$0xff]  ;;  %v831_v54 = vld [vmem:[#allocation7 + $0x478] sm:$0xff] }
  0xdf   :  { %v1616_v63 = vpack.c.bf16 %v813_v61, %v809_v60 }
  0xe0   :  { %1595 = vmatpush1.bf16.msra.mxu0 %v1594_v2  ;;  %v812_v2 = vld [vmem:[#allocation7 + $0x3e0] sm:$0xff] }
  0xe1   :  { %1723 = vmatpush1.bf16.msra.mxu1 %v1722_v3  ;;  %1597 = vmatprep.subr.bf16.mxu0 %v1596_v4  ;;  %v1744_v3 = vpack.c.bf16 %v815_v0, %v811_v62  ;;  %v1618_v4 = vpack.c.bf16 %v812_v2, %v808_v1  ;;  %v828_v0 = vld [vmem:[#allocation7 + $0x460] sm:$0xff]  ;;  %v826_v1 = vld [vmem:[#allocation7 + $0x450] sm:$0xff] }
  0xe2   :  { %1725 = vmatprep.subr.bf16.mxu1 %v1724_v7  ;;  %v1746_v7 = vpack.c.bf16 %v814_v6, %v810_v5  ;;  %v830_v2 = vld [vmem:[#allocation7 + $0x470] sm:$0xff] }
  0xe4   :  { %1599 = vmatpush1.bf16.msra.mxu0 %v1598_v10  ;;  %v819_v10 = vld [vmem:[#allocation7 + $0x418] sm:$0xff] }
  0xe5   :  { %1727 = vmatpush1.bf16.msra.mxu1 %v1726_v11  ;;  %1601 = vmatprep.subr.bf16.mxu0 %v1600_v15  ;;  %v1620_v11 = vpack.c.bf16 %v821_v9, %v817_v8  ;;  %v1748_v13 = vpack.c.bf16 %v823_v12, %v819_v10  ;;  %v2048_v15 = vshrl.u32 %v328_v14, 7  ;;  %v835_v8 = vld [vmem:[#allocation7 + $0x498] sm:$0xff]  ;;  %v832_v12 = vld [vmem:[#allocation7 + $0x480] sm:$0xff] }
  0xe6   :  { %1729 = vmatprep.subr.bf16.mxu1 %v1728_v19  ;;  %v839_v9 = vld [vmem:[#allocation7 + $0x4b8] sm:$0xff] }
  0xe7   :  { %v330_v16 = vsub.s32 0, %v2048_v15  ;;  %v334_v18 = vsub.s32 1, %v2048_v15  ;;  %v342_v19 = vsub.s32 3, %v2048_v15 }
  0xe8   :  { %1603 = vmatpush1.bf16.msra.mxu0 %v1602_v20 }
  0xe9   :  { %1731 = vmatpush1.bf16.msra.mxu1 %v1730_v23  ;;  %1605 = vmatprep.subr.bf16.mxu0 %v1604_v27  ;;  %v331_v20 = vrot.slane %v2054_v17, %v330_v16  ;;  %v335_v21 = vrot.slane %v2054_v17, %v334_v18  ;;  %v2067_v22 = vrot.slane %v2054_v17, %v342_v19 }
  0xea   :  { %1733 = vmatprep.subr.bf16.mxu1 %v1732_v31 }
  0xec   :  { %1607 = vmatpush1.bf16.msra.mxu0 %v1606_v32 }
  0xed   :  { %1735 = vmatpush1.bf16.msra.mxu1 %v1734_v35  ;;  %1609 = vmatprep.subr.bf16.mxu0 %v1608_v39 }
  0xee   :  { %1737 = vmatprep.subr.bf16.mxu1 %v1736_v43 }
  0xf0   :  { %1611 = vmatpush1.bf16.msra.mxu0 %v1610_v44 }
  0xf1   :  { %1739 = vmatpush1.bf16.msra.mxu1 %v1738_v47  ;;  %1613 = vmatprep.subr.bf16.mxu0 %v1612_v51  ;;  %v822_v47 = vld [vmem:[#allocation7 + $0x430] sm:$0xff]  ;;  %v829_v51 = vld [vmem:[#allocation7 + $0x468] sm:$0xff] }
  0xf2   :  { %1741 = vmatprep.subr.bf16.mxu1 %v1740_v55  ;;  %v1750_v58 = vpack.c.bf16 %v822_v47, %v818_v46  ;;  %v848_v47 = vld [vmem:[#allocation7 + $0x500] sm:$0xff] }
  0xf4   :  { %1615 = vmatpush1.bf16.msra.mxu0 %v1614_v56 }
  0xf5   :  { %1743 = vmatpush1.bf16.msra.mxu1 %v1742_v59  ;;  %1617 = vmatprep.subr.bf16.mxu0 %v1616_v63  ;;  %v824_v59 = vld [vmem:[#allocation7 + $0x440] sm:$0xff]  ;;  %v1624_v63 = vpack.c.bf16 %v829_v51, %v825_v50  ;;  %v850_v51 = vld [vmem:[#allocation7 + $0x510] sm:$0xff] }
  0xf6   :  { %1745 = vmatprep.subr.bf16.mxu1 %v1744_v3  ;;  %v1752_v3 = vpack.c.bf16 %v831_v54, %v827_v53  ;;  %v1626_v10 = vpack.c.bf16 %v828_v0, %v824_v59  ;;  %v857_v53 = vld [vmem:[#allocation7 + $0x548] sm:$0xff]  ;;  %v856_v59 = vld [vmem:[#allocation7 + $0x540] sm:$0xff]  ;;  %v862_v0 = vld [vmem:[#allocation7 + $0x570] sm:$0xff] }
  0xf7   :  { %v861_v54 = vld [vmem:[#allocation7 + $0x568] sm:$0xff] }
  0xf8   :  { %1619 = vmatpush1.bf16.msra.mxu0 %v1618_v4  ;;  %v833_v4 = vld [vmem:[#allocation7 + $0x488] sm:$0xff] }
  0xf9   :  { %1747 = vmatpush1.bf16.msra.mxu1 %v1746_v7  ;;  %1621 = vmatprep.subr.bf16.mxu0 %v1620_v11  ;;  %v837_v7 = vld [vmem:[#allocation7 + $0x4a8] sm:$0xff]  ;;  %v1754_v11 = vpack.c.bf16 %v830_v2, %v826_v1 }
  0xfa   :  { %1749 = vmatprep.subr.bf16.mxu1 %v1748_v13  ;;  %v836_v13 = vld [vmem:[#allocation7 + $0x4a0] sm:$0xff]  ;;  %v865_v1 = vld [vmem:[#allocation7 + $0x588] sm:$0xff] }
  0xfb   :  { %v869_v2 = vld [vmem:[#allocation7 + $0x5a8] sm:$0xff] }
 0x18d   :  { %v491_v23 = vpop.f32.mrb[0].mxu0 }
 0x18e   :  { %v1812_v24 = vadd.f32 %v491_v23, %v331_v20  ;;  %v2069_v25 = vpop.f32.mrb[0].mxu1  ;;  %v493_v26 = vpop.f32.mrb[1].mxu0  ;;  %v841_v23 = vld [vmem:[#allocation7 + $0x4c8] sm:$0xff] }
 0x18f   :  { %v1813_v27 = vadd.f32 %v493_v26, %v335_v21  ;;  %v647_v28 = vpop.f32.mrb[1].mxu1  ;;  %v1756_v26 = vpack.c.bf16 %v839_v9, %v835_v8  ;;  %v868_v8 = vld [vmem:[#allocation7 + $0x5a0] sm:$0xff]  ;;  %v1644_v9 = vpack.c.bf16 %v869_v2, %v865_v1 }
 0x190   :  { %v656_v29 = vmul.f32 0.5, %v1812_v24  ;;  %v1817_v30 = vadd.f32 %v647_v28, %v2067_v22  ;;  %v1628_v24 = vpack.c.bf16 %v837_v7, %v833_v4  ;;  %v843_v28 = vld [vmem:[#allocation7 + $0x4d8] sm:$0xff]  ;;  %v864_v7 = vld [vmem:[#allocation7 + $0x580] sm:$0xff] }
 0x191   :  { %v657_v31 = vmul.f32 0.5, %v1813_v27  ;;  %v497_v32 = vpop.f32.mrb[2].mxu0  ;;  %v845_v27 = vld [vmem:[#allocation7 + $0x4e8] sm:$0xff]  ;;  %v871_v4 = vld [vmem:[#allocation7 + $0x5b8] sm:$0xff]  ;;  %v896_v2 = vld [vmem:[#allocation7 + $0x680] sm:$0xff] }
 0x192   :  { %1850 = vtanh.f32 %v656_v29  ;;  %v659_v33 = vmul.f32 0.5, %v1817_v30  ;;  %v1814_v34 = vadd.f32 %v497_v32, %v331_v20  ;;  %v499_v35 = vpop.f32.mrb[3].mxu0  ;;  %v2072_v36 = vpop.f32.mrb[2].mxu1  ;;  %v834_v20 = vld [vmem:[#allocation7 + $0x490] sm:$0xff]  ;;  %v847_v29 = vld [vmem:[#allocation7 + $0x4f8] sm:$0xff] }
 0x193   :  { %v1815_v37 = vadd.f32 %v499_v35, %v335_v21  ;;  %v2074_v38 = vpop.f32.mrb[3].mxu1  ;;  %1852 = vtanh.f32 %v657_v31  ;;  %v838_v21 = vld [vmem:[#allocation7 + $0x4b0] sm:$0xff]  ;;  %v1630_v31 = vpack.c.bf16 %v836_v13, %v832_v12  ;;  %v1632_v35 = vpack.c.bf16 %v845_v27, %v841_v23  ;;  %v873_v13 = vld [vmem:[#allocation7 + $0x5c8] sm:$0xff]  ;;  %v876_v27 = vld [vmem:[#allocation7 + $0x5e0] sm:$0xff] }
 0x194   :  { %v660_v39 = vmul.f32 0.5, %v1814_v34  ;;  %1854 = vtanh.f32 %v659_v33  ;;  %v1758_v32 = vpack.c.bf16 %v838_v21, %v834_v20  ;;  %v840_v33 = vld [vmem:[#allocation7 + $0x4c0] sm:$0xff]  ;;  %v870_v12 = vld [vmem:[#allocation7 + $0x5b0] sm:$0xff]  ;;  %v875_v20 = vld [vmem:[#allocation7 + $0x5d8] sm:$0xff]  ;;  %v1646_v23 = vpack.c.bf16 %v868_v8, %v864_v7 }
 0x195   :  { %v661_v40 = vmul.f32 0.5, %v1815_v37  ;;  %v844_v34 = vld [vmem:[#allocation7 + $0x4e0] sm:$0xff]  ;;  %v1760_v37 = vpack.c.bf16 %v847_v29, %v843_v28  ;;  %v879_v21 = vld [vmem:[#allocation7 + $0x5f8] sm:$0xff]  ;;  %v902_v7 = vld [vmem:[#allocation7 + $0x6b0] sm:$0xff] }
 0x196   :  { %1856 = vtanh.f32 %v660_v39  ;;  %v842_v39 = vld [vmem:[#allocation7 + $0x4d0] sm:$0xff]  ;;  %v1634_v45 = vpack.c.bf16 %v844_v34, %v840_v33  ;;  %v1776_v29 = vpack.c.bf16 %v879_v21, %v875_v20  ;;  %v885_v33 = vld [vmem:[#allocation7 + $0x628] sm:$0xff]  ;;  %v883_v34 = vld [vmem:[#allocation7 + $0x618] sm:$0xff]  ;;  %v1819_v21 = vadd.f32 %v2074_v38, %v2067_v22 }
 0x197   :  { %1858 = vtanh.f32 %v661_v40  ;;  %v846_v40 = vld [vmem:[#allocation7 + $0x4f0] sm:$0xff]  ;;  %v905_v8 = vld [vmem:[#allocation7 + $0x6c8] sm:$0xff]  ;;  %v908_v20 = vld [vmem:[#allocation7 + $0x6e0] sm:$0xff] }
 0x198   :  { %v1762_v46 = vpack.c.bf16 %v846_v40, %v842_v39  ;;  %v880_v40 = vld [vmem:[#allocation7 + $0x600] sm:$0xff]  ;;  %v663_v22 = vmul.f32 0.5, %v1819_v21 }
 0x19c   :  { %v1851_v41 = vpop.eup %1850 }
 0x19d   :  { %v1853_v43 = vpop.eup %1852  ;;  %v672_v44 = vadd.f32 1.0, %v1851_v41  ;;  %v849_v41 = vld [vmem:[#allocation7 + $0x508] sm:$0xff] }
 0x19e   :  { %v1855_v48 = vpop.eup %1854  ;;  %v673_v49 = vadd.f32 1.0, %v1853_v43  ;;  %v851_v43 = vld [vmem:[#allocation7 + $0x518] sm:$0xff] }
 0x19f   :  { %v680_v60 = vmul.f32 0.5, %v672_v44  ;;  %v675_v5 = vadd.f32 1.0, %v1855_v48  ;;  %v855_v44 = vld [vmem:[#allocation7 + $0x538] sm:$0xff]  ;;  %v852_v48 = vld [vmem:[#allocation7 + $0x520] sm:$0xff] }
 0x1a0   :  { %v1857_v52 = vpop.eup %1856  ;;  %v681_v56 = vmul.f32 0.5, %v673_v49  ;;  %v1636_v49 = vpack.c.bf16 %v853_v42, %v849_v41  ;;  %v1764_v50 = vpack.c.bf16 %v855_v44, %v851_v43  ;;  %v884_v41 = vld [vmem:[#allocation7 + $0x620] sm:$0xff]  ;;  %v882_v44 = vld [vmem:[#allocation7 + $0x610] sm:$0xff] }
 0x1a1   :  { %v1859_v55 = vpop.eup %1858  ;;  %v676_v61 = vadd.f32 1.0, %v1857_v52  ;;  %v683_v30 = vmul.f32 0.5, %v675_v5  ;;  %v854_v52 = vld [vmem:[#allocation7 + $0x530] sm:$0xff] }
 0x1a2   :  { %v677_v62 = vadd.f32 1.0, %v1859_v55  ;;  %1030 = vmatprep.mubr.f32.mxu0 %v681_v56  ;;  %1184 = vmatprep.mubr.f32.mxu1 %v681_v56  ;;  %v859_v55 = vld [vmem:[#allocation7 + $0x558] sm:$0xff] }
 0x1a3   :  { %1031 = vmatmul.mubr.f32.vlgmr.msra.gmra.mrb[4].mxu0 %v680_v60  ;;  %1185 = vmatmul.mubr.f32.vlgmr.msra.gmra.mrb[4].mxu1 %v680_v60  ;;  %v684_v14 = vmul.f32 0.5, %v676_v61  ;;  %v863_v56 = vld [vmem:[#allocation7 + $0x578] sm:$0xff]  ;;  %v860_v60 = vld [vmem:[#allocation7 + $0x560] sm:$0xff]  ;;  %v1640_v61 = vpack.c.bf16 %v861_v54, %v857_v53 }
 0x1a4   :  { %v685_v6 = vmul.f32 0.5, %v677_v62  ;;  %1623 = vmatpush1.bf16.msra.mxu0 %v1622_v57  ;;  %1751 = vmatpush1.bf16.msra.mxu1 %v1750_v58  ;;  %v1638_v57 = vpack.c.bf16 %v852_v48, %v848_v47  ;;  %v1766_v58 = vpack.c.bf16 %v854_v52, %v850_v51  ;;  %v1768_v62 = vpack.c.bf16 %v863_v56, %v859_v55  ;;  %v893_v47 = vld [vmem:[#allocation7 + $0x668] sm:$0xff]  ;;  %v891_v48 = vld [vmem:[#allocation7 + $0x658] sm:$0xff]  ;;  %v888_v53 = vld [vmem:[#allocation7 + $0x640] sm:$0xff] }
 0x1a5   :  { %1625 = vmatprep.subr.bf16.mxu0 %v1624_v63  ;;  %1753 = vmatprep.subr.bf16.mxu1 %v1752_v3  ;;  %v858_v63 = vld [vmem:[#allocation7 + $0x550] sm:$0xff]  ;;  %v867_v3 = vld [vmem:[#allocation7 + $0x598] sm:$0xff]  ;;  %v1642_v5 = vpack.c.bf16 %v860_v60, %v856_v59  ;;  %v1654_v51 = vpack.c.bf16 %v884_v41, %v880_v40  ;;  %v892_v54 = vld [vmem:[#allocation7 + $0x660] sm:$0xff] }
 0x1a6   :  { %1036 = vmatprep.mubr.f32.mxu0 %v685_v6  ;;  %1190 = vmatprep.mubr.f32.mxu1 %v685_v6  ;;  %v1770_v6 = vpack.c.bf16 %v862_v0, %v858_v63  ;;  %v897_v59 = vld [vmem:[#allocation7 + $0x688] sm:$0xff]  ;;  %v1658_v0 = vpack.c.bf16 %v892_v54, %v888_v53  ;;  %v914_v40 = vld [vmem:[#allocation7 + $0x710] sm:$0xff] }
 0x1a7   :  { %1037 = vmatmul.mubr.f32.gmra.mrb[6].mxu0 %v684_v14  ;;  %1191 = vmatmul.mubr.f32.gmra.mrb[6].mxu1 %v684_v14  ;;  %v877_v14 = vld [vmem:[#allocation7 + $0x5e8] sm:$0xff]  ;;  %v918_v41 = vld [vmem:[#allocation7 + $0x730] sm:$0xff] }
 0x1a8   :  { %1627 = vmatpush1.bf16.msra.mxu0 %v1626_v10  ;;  %1755 = vmatpush1.bf16.msra.mxu1 %v1754_v11  ;;  %v1772_v10 = vpack.c.bf16 %v871_v4, %v867_v3  ;;  %v866_v11 = vld [vmem:[#allocation7 + $0x590] sm:$0xff]  ;;  %v1648_v28 = vpack.c.bf16 %v877_v14, %v873_v13  ;;  %v901_v60 = vld [vmem:[#allocation7 + $0x6a8] sm:$0xff]  ;;  %v900_v3 = vld [vmem:[#allocation7 + $0x6a0] sm:$0xff] }
 0x1a9   :  { %1107 = vmatprep.mubr.f32.mxu0 %v683_v30  ;;  %1261 = vmatprep.mubr.f32.mxu1 %v683_v30  ;;  %v874_v30 = vld [vmem:[#allocation7 + $0x5d0] sm:$0xff]  ;;  %v1660_v4 = vpack.c.bf16 %v901_v60, %v897_v59  ;;  %v904_v14 = vld [vmem:[#allocation7 + $0x6c0] sm:$0xff] }
 0x1aa   :  { %1629 = vmatprep.subr.bf16.mxu0 %v1628_v24  ;;  %1757 = vmatprep.subr.bf16.mxu1 %v1756_v26  ;;  %v1774_v24 = vpack.c.bf16 %v870_v12, %v866_v11  ;;  %v872_v26 = vld [vmem:[#allocation7 + $0x5c0] sm:$0xff]  ;;  %v911_v11 = vld [vmem:[#allocation7 + $0x6f8] sm:$0xff]  ;;  %v922_v53 = vld [vmem:[#allocation7 + $0x750] sm:$0xff] }
 0x1ab   :  { %v926_v54 = vld [vmem:[#allocation7 + $0x770] sm:$0xff] }
 0x1ac   :  { %1631 = vmatpush1.bf16.msra.mxu0 %v1630_v31  ;;  %1759 = vmatpush1.bf16.msra.mxu1 %v1758_v32  ;;  %v878_v31 = vld [vmem:[#allocation7 + $0x5f0] sm:$0xff]  ;;  %v881_v32 = vld [vmem:[#allocation7 + $0x608] sm:$0xff]  ;;  %v1802_v60 = vpack.c.bf16 %v926_v54, %v922_v53 }
 0x1ad   :  { %1633 = vmatprep.subr.bf16.mxu0 %v1632_v35  ;;  %1761 = vmatprep.subr.bf16.mxu1 %v1760_v37  ;;  %v887_v35 = vld [vmem:[#allocation7 + $0x638] sm:$0xff]  ;;  %v1650_v37 = vpack.c.bf16 %v876_v27, %v872_v26  ;;  %v1778_v39 = vpack.c.bf16 %v878_v31, %v874_v30  ;;  %v1652_v42 = vpack.c.bf16 %v885_v33, %v881_v32  ;;  %v906_v26 = vld [vmem:[#allocation7 + $0x6d0] sm:$0xff] }
 0x1ae   :  { %v1780_v43 = vpack.c.bf16 %v887_v35, %v883_v34  ;;  %v910_v27 = vld [vmem:[#allocation7 + $0x6f0] sm:$0xff]  ;;  %v915_v30 = vld [vmem:[#allocation7 + $0x718] sm:$0xff]  ;;  %v1666_v33 = vpack.c.bf16 %v908_v20, %v904_v14  ;;  %v912_v35 = vld [vmem:[#allocation7 + $0x700] sm:$0xff] }
 0x1af   :  { %v919_v31 = vld [vmem:[#allocation7 + $0x738] sm:$0xff]  ;;  %v1794_v34 = vpack.c.bf16 %v910_v27, %v906_v26 }
 0x1b0   :  { %1635 = vmatpush1.bf16.msra.mxu0 %v1634_v45  ;;  %1763 = vmatpush1.bf16.msra.mxu1 %v1762_v46  ;;  %v886_v45 = vld [vmem:[#allocation7 + $0x630] sm:$0xff]  ;;  %v889_v46 = vld [vmem:[#allocation7 + $0x648] sm:$0xff] }
 0x1b1   :  { %1637 = vmatprep.subr.bf16.mxu0 %v1636_v49  ;;  %1765 = vmatprep.subr.bf16.mxu1 %v1764_v50  ;;  %v895_v49 = vld [vmem:[#allocation7 + $0x678] sm:$0xff]  ;;  %v338_v50 = vsub.s32 2, %v2048_v15  ;;  %v1782_v52 = vpack.c.bf16 %v886_v45, %v882_v44  ;;  %v1656_v55 = vpack.c.bf16 %v893_v47, %v889_v46  ;;  %v1798_v47 = vpack.c.bf16 %v918_v41, %v914_v40 }
 0x1b2   :  { %v1784_v56 = vpack.c.bf16 %v895_v49, %v891_v48  ;;  %v923_v44 = vld [vmem:[#allocation7 + $0x758] sm:$0xff]  ;;  %v920_v48 = vld [vmem:[#allocation7 + $0x740] sm:$0xff] }
 0x1b3   :  { %v339_v63 = vrot.slane %v2054_v17, %v338_v50  ;;  %v1662_v17 = vpack.c.bf16 %v900_v3, %v896_v2  ;;  %v927_v45 = vld [vmem:[#allocation7 + $0x778] sm:$0xff]  ;;  %v924_v49 = vld [vmem:[#allocation7 + $0x760] sm:$0xff]  ;;  %v934_v2 = vld [vmem:[#allocation7 + $0x7b0] sm:$0xff] }
 0x1b4   :  { %1639 = vmatpush1.bf16.msra.mxu0 %v1638_v57  ;;  %1767 = vmatpush1.bf16.msra.mxu1 %v1766_v58  ;;  %v890_v57 = vld [vmem:[#allocation7 + $0x650] sm:$0xff]  ;;  %v1674_v59 = vpack.c.bf16 %v924_v49, %v920_v48  ;;  %v937_v3 = vld [vmem:[#allocation7 + $0x7c8] sm:$0xff] }
 0x1b5   :  { %1641 = vmatprep.subr.bf16.mxu0 %v1640_v61  ;;  %1769 = vmatprep.subr.bf16.mxu1 %v1768_v62  ;;  %v894_v58 = vld [vmem:[#allocation7 + $0x670] sm:$0xff]  ;;  %v899_v61 = vld [vmem:[#allocation7 + $0x698] sm:$0xff]  ;;  %v1816_v12 = vadd.f32 %v2069_v25, %v339_v63  ;;  %v1818_v32 = vadd.f32 %v2072_v36, %v339_v63 }
 0x1b6   :  { %v903_v62 = vld [vmem:[#allocation7 + $0x6b8] sm:$0xff]  ;;  %v1786_v1 = vpack.c.bf16 %v894_v58, %v890_v57 }
 0x1b7   :  { %v658_v25 = vmul.f32 0.5, %v1816_v12  ;;  %v662_v46 = vmul.f32 0.5, %v1818_v32  ;;  %v931_v57 = vld [vmem:[#allocation7 + $0x798] sm:$0xff]  ;;  %v940_v12 = vld [vmem:[#allocation7 + $0x7e0] sm:$0xff] }
 0x1b8   :  { %1643 = vmatpush1.bf16.msra.mxu0 %v1642_v5  ;;  %1771 = vmatpush1.bf16.msra.mxu1 %v1770_v6  ;;  %v1788_v5 = vpack.c.bf16 %v903_v62, %v899_v61  ;;  %v898_v6 = vld [vmem:[#allocation7 + $0x690] sm:$0xff]  ;;  %v935_v58 = vld [vmem:[#allocation7 + $0x7b8] sm:$0xff]  ;;  %v928_v61 = vld [vmem:[#allocation7 + $0x780] sm:$0xff] }
 0x1b9   :  { %1645 = vmatprep.subr.bf16.mxu0 %v1644_v9  ;;  %1773 = vmatprep.subr.bf16.mxu1 %v1772_v10  ;;  %v909_v9 = vld [vmem:[#allocation7 + $0x6e8] sm:$0xff]  ;;  %v907_v10 = vld [vmem:[#allocation7 + $0x6d8] sm:$0xff]  ;;  %v1790_v13 = vpack.c.bf16 %v902_v7, %v898_v6  ;;  %1860 = vtanh.f32 %v658_v25  ;;  %v932_v62 = vld [vmem:[#allocation7 + $0x7a0] sm:$0xff] }
 0x1ba   :  { %1862 = vtanh.f32 %v663_v22  ;;  %v943_v6 = vld [vmem:[#allocation7 + $0x7f8] sm:$0xff]  ;;  %v1678_v7 = vpack.c.bf16 %v932_v62, %v928_v61  ;;  %v944_v25 = vld [vmem:[%s2114_s4] sm:$0xf]  ;;  %s1965_s4 = smov [#allocation8]  }
 0x1bb   :  { %1864 = vtanh.f32 %v662_v46  ;;  %v949_v32 = vrot.slane %v944_v25, %v330_v16  ;;  %s1287_s8 = sshll.u32 %s1965_s4, 4  ;;  %s1288_s8 = int_to_ptr.vmem [resolvable:$true] %s1287_s8 }
 0x1bc   :  { %1647 = vmatpush1.bf16.msra.mxu0 %v1646_v23  ;;  %1775 = vmatpush1.bf16.msra.mxu1 %v1774_v24  ;;  %v1664_v23 = vpack.c.bf16 %v909_v9, %v905_v8  ;;  %v1792_v24 = vpack.c.bf16 %v911_v11, %v907_v10  ;;  %v936_v9 = vld [vmem:[#allocation7 + $0x7c0] sm:$0xff]  ;;  %s1932_s9 = scalar_lea.vmem %s1288_s8, 1024  ;;  %p1937_p11 = scmp.lt.s32.totalorder %s1288_s8, %s1288_s8 }
 0x1bd   :  { %1649 = vmatprep.subr.bf16.mxu0 %v1648_v28  ;;  %1777 = vmatprep.subr.bf16.mxu1 %v1776_v29  ;;  %v913_v28 = vld [vmem:[#allocation7 + $0x708] sm:$0xff]  ;;  %v1682_v21 = vpack.c.bf16 %v940_v12, %v936_v9  ;;  %p1933_p10 = scmp.ne.s32.totalorder %s1288_s8, %s1932_s9  ;;  %p1938_p12 = scmp.lt.s32.totalorder %s1932_s9, %s1932_s9 }
 0x1be   :  { %v917_v29 = vld [vmem:[#allocation7 + $0x728] sm:$0xff] }
 0x1bf   :  { %v1668_v38 = vpack.c.bf16 %v917_v29, %v913_v28  ;;  %p1939_p13 = por %p1938_p12, %p1937_p11 }
 0x1c0   :  { %1651 = vmatpush1.bf16.msra.mxu0 %v1650_v37  ;;  %1779 = vmatpush1.bf16.msra.mxu1 %v1778_v39  ;;  %v916_v37 = vld [vmem:[#allocation7 + $0x720] sm:$0xff]  ;;  %v1796_v39 = vpack.c.bf16 %v919_v31, %v915_v30 }
 0x1c1   :  { %1653 = vmatprep.subr.bf16.mxu0 %v1652_v42  ;;  %1781 = vmatprep.subr.bf16.mxu1 %v1780_v43  ;;  %v921_v42 = vld [vmem:[#allocation7 + $0x748] sm:$0xff]  ;;  %v1670_v36 = vpack.c.bf16 %v916_v37, %v912_v35  ;;  %v961_v35 = vrot.slane %v944_v25, %v342_v19  ;;  %p1940_p0 = pnand %p1939_p13, %p1933_p10 }
 0x1c2   :  { %v925_v43 = vld [vmem:[#allocation7 + $0x768] sm:$0xff] }
 0x1c3   :  { %v1861_v14 = vpop.eup %1860 }
 0x1c4   :  { %1655 = vmatpush1.bf16.msra.mxu0 %v1654_v51  ;;  %1783 = vmatpush1.bf16.msra.mxu1 %v1782_v52  ;;  %v1672_v51 = vpack.c.bf16 %v925_v43, %v921_v42  ;;  %v1800_v52 = vpack.c.bf16 %v927_v45, %v923_v44  ;;  %v1863_v20 = vpop.eup %1862 }
 0x1c5   :  { %1657 = vmatprep.subr.bf16.mxu0 %v1656_v55  ;;  %1785 = vmatprep.subr.bf16.mxu1 %v1784_v56  ;;  %v929_v55 = vld [vmem:[#allocation7 + $0x788] sm:$0xff]  ;;  %v1865_v26 = vpop.eup %1864  ;;  %v679_v27 = vadd.f32 1.0, %v1863_v20 }
 0x1c6   :  { %v933_v56 = vld [vmem:[#allocation7 + $0x7a8] sm:$0xff]  ;;  %v678_v29 = vadd.f32 1.0, %v1865_v26 }
 0x1c7   :  { %v1676_v63 = vpack.c.bf16 %v933_v56, %v929_v55  ;;  %v687_v30 = vmul.f32 0.5, %v679_v27 }
 0x1c8   :  { %1659 = vmatpush1.bf16.msra.mxu0 %v1658_v0  ;;  %1787 = vmatpush1.bf16.msra.mxu1 %v1786_v1  ;;  %v1804_v0 = vpack.c.bf16 %v935_v58, %v931_v57  ;;  %v930_v1 = vld [vmem:[#allocation7 + $0x790] sm:$0xff]  ;;  %v686_v31 = vmul.f32 0.5, %v678_v29 }
 0x1c9   :  { %1661 = vmatprep.subr.bf16.mxu0 %v1660_v4  ;;  %1789 = vmatprep.subr.bf16.mxu1 %v1788_v5  ;;  %v941_v4 = vld [vmem:[#allocation7 + $0x7e8] sm:$0xff]  ;;  %v939_v5 = vld [vmem:[#allocation7 + $0x7d8] sm:$0xff]  ;;  %v1806_v8 = vpack.c.bf16 %v934_v2, %v930_v1 }
 0x1ca   :  { %v1680_v10 = vpack.c.bf16 %v941_v4, %v937_v3  ;;  %v1808_v11 = vpack.c.bf16 %v943_v6, %v939_v5 }
 0x1cc   :  { %1663 = vmatpush1.bf16.msra.mxu0 %v1662_v17  ;;  %1791 = vmatpush1.bf16.msra.mxu1 %v1790_v13  ;;  %v938_v17 = vld [vmem:[#allocation7 + $0x7d0] sm:$0xff] }
 0x1cd   :  { %1665 = vmatprep.subr.bf16.mxu0 %v1664_v23  ;;  %1793 = vmatprep.subr.bf16.mxu1 %v1792_v24  ;;  %v942_v13 = vld [vmem:[#allocation7 + $0x7f0] sm:$0xff]  ;;  %v674_v24 = vadd.f32 1.0, %v1861_v14 }
 0x1ce   :  { %v1810_v23 = vpack.c.bf16 %v942_v13, %v938_v17 }
 0x1cf   :  { %v682_v28 = vmul.f32 0.5, %v674_v24 }
 0x1d0   :  { %1667 = vmatpush1.bf16.msra.mxu0 %v1666_v33  ;;  %1795 = vmatpush1.bf16.msra.mxu1 %v1794_v34  ;;  %v957_v33 = vrot.slane %v944_v25, %v338_v50  ;;  %v953_v34 = vrot.slane %v944_v25, %v334_v18 }
 0x1d1   :  { %1669 = vmatprep.subr.bf16.mxu0 %v1668_v38  ;;  %1797 = vmatprep.subr.bf16.mxu1 %v1796_v39 }
 0x1d4   :  { %1671 = vmatpush1.bf16.msra.mxu0 %v1670_v36  ;;  %1799 = vmatpush1.bf16.msra.mxu1 %v1798_v47 }
 0x1d5   :  { %1673 = vmatprep.subr.bf16.mxu0 %v1672_v51  ;;  %1801 = vmatprep.subr.bf16.mxu1 %v1800_v52 }
 0x1d8   :  { %1675 = vmatpush1.bf16.msra.mxu0 %v1674_v59  ;;  %1803 = vmatpush1.bf16.msra.mxu1 %v1802_v60 }
 0x1d9   :  { %1677 = vmatprep.subr.bf16.mxu0 %v1676_v63  ;;  %1805 = vmatprep.subr.bf16.mxu1 %v1804_v0 }
 0x1dc   :  { %1679 = vmatpush1.bf16.msra.mxu0 %v1678_v7  ;;  %1807 = vmatpush1.bf16.msra.mxu1 %v1806_v8 }
 0x1dd   :  { %1681 = vmatprep.subr.bf16.mxu0 %v1680_v10  ;;  %1809 = vmatprep.subr.bf16.mxu1 %v1808_v11 }
 0x1e0   :  { %1683 = vmatpush1.bf16.msra.mxu0 %v1682_v21  ;;  %1811 = vmatpush1.bf16.msra.mxu1 %v1810_v23 }
 0x1e3   :  { %1108 = vmatmul.mubr.f32.vlgmr.msra.gmra.mrb[4].mxu0 %v682_v28  ;;  %1262 = vmatmul.mubr.f32.vlgmr.msra.gmra.mrb[4].mxu1 %v682_v28 }
 0x1e4   :  { %1113 = vmatprep.mubr.f32.mxu0 %v687_v30  ;;  %1267 = vmatprep.mubr.f32.mxu1 %v687_v30 }
 0x1e7   :  { %1114 = vmatmul.mubr.f32.gmra.mrb[6].mxu0 %v686_v31  ;;  %1268 = vmatmul.mubr.f32.gmra.mrb[6].mxu1 %v686_v31 }
 0x2b6   :  { %v1109_v37 = vpop.f32.mrb[4].mxu0  ;;  %v1263_v22 = vpop.f32.mrb[4].mxu1 }
 0x2b7   :  { %v1820_v38 = vadd.f32 %v1109_v37, %v949_v32  ;;  %v1824_v39 = vadd.f32 %v1263_v22, %v957_v33  ;;  %v1111_v40 = vpop.f32.mrb[5].mxu0  ;;  %v1265_v41 = vpop.f32.mrb[5].mxu1 }
 0x2b8   :  { %v1821_v42 = vadd.f32 %v1111_v40, %v953_v34  ;;  %v1825_v43 = vadd.f32 %v1265_v41, %v961_v35 }
 0x2b9   :  { %1274 = vst [vmem:[#allocation8] sm:$0xff] %v1820_v38  ;;  %1276 = vst [vmem:[#allocation8 + $0x10] sm:$0xff] %v1824_v39 }
 0x2ba   :  { %1275 = vst [vmem:[#allocation8 + $0x8] sm:$0xff] %v1821_v42  ;;  %1277 = vst [vmem:[#allocation8 + $0x18] sm:$0xff] %v1825_v43  ;;  %v1115_v16 = vpop.f32.mrb[6].mxu0  ;;  %v1269_v50 = vpop.f32.mrb[6].mxu1 }
 0x2bb   :  { %v1822_v18 = vadd.f32 %v1115_v16, %v949_v32  ;;  %v1826_v44 = vadd.f32 %v1269_v50, %v957_v33  ;;  %v1117_v15 = vpop.f32.mrb[7].mxu0  ;;  %v1271_v19 = vpop.f32.mrb[7].mxu1 }
 0x2bc   :  { %v1823_v45 = vadd.f32 %v1117_v15, %v953_v34  ;;  %v1827_v46 = vadd.f32 %v1271_v19, %v961_v35 }
 0x2bd   :  { %1278 = vst [vmem:[#allocation8 + $0x20] sm:$0xff] %v1822_v18  ;;  %1280 = vst [vmem:[#allocation8 + $0x30] sm:$0xff] %v1826_v44 }
 0x2be   :  { %1279 = vst [vmem:[#allocation8 + $0x28] sm:$0xff] %v1823_v45  ;;  %1281 = vst [vmem:[#allocation8 + $0x38] sm:$0xff] %v1827_v46 }
 0x2bf   :  { %1943 = shalt.err (!%p1940_p0)
}
 0x2c0   :  { %s1944_s12 = scalar_lea.hbm %s2115_s5, 1024 }
 0x2c1   :  { %p1945_p1 = scmp.ne.s32.totalorder %s2115_s5, %s1944_s12  ;;  %p1948_p2 = scmp.lt.u32.totalorder %s1944_s12, %s2115_s5 }
 0x2c3   :  { %p1950_p3 = pnand %p1948_p2, %p1945_p1 }
 0x2c5   :  { %1953 = shalt.err (!%p1950_p3)
}
 0x2c6   :  { %1293 = dma.vmem_to_hbm [thread:$0]  %s1288_s8, 1024, %s2115_s5, [#allocation4], %s1962_s30, %s1962_s30, %s1963_s6  }
 0x2c7   :  { %1958 = dma.done.wait [#allocation4], 1024  }
 0x2c8   :  { %1959 = vsyncadd [#allocation4], 4294966272 }
 0x2c9   :  { %1297 = vsyncpa [#allocation3], 1 }
 0x2ca   :  { %1298 = vsyncpa [#allocation6], 1 }
 0x2cb   :  { %1299 = vsyncpa [#allocation4], 1 }

</bundles_post_ra>
